<compile_context>
chip_gen: v7x
topology: tpu7x:2x2x1
jax: 0.10.0
libtpu: 0.0.40
codegen_flags: <defaults>
</compile_context>

<pallas_src>
import functools

import numpy as np
import jax
import jax.numpy as jnp
from jax.experimental import pallas as pl
from jax.experimental.pallas import tpu as pltpu


def _rms_norm(x, g, eps=1e-8):
    # Matches RMSNorm: x / clamp(||x||_2 * dim^-0.5, eps) * g, with the divide
    # rewritten as rsqrt + min so it runs on the EUP instead of two VALU divides.
    dim = x.shape[-1]
    ss = jnp.sum(x * x, axis=-1, keepdims=True)
    inv = jnp.minimum(jax.lax.rsqrt(ss) * (dim ** 0.5), 1.0 / eps)
    return x * inv * g


def map_block_kernel(x_ref,
                     ws_ref, bs_ref, wv_ref, et_ref,
                     wproj_ref, battn_ref, g_attn_ref,
                     w1p_ref, b1p_ref, w1g_ref, b1g_ref,
                     w2_ref, b2_ref, g_mlp_ref,
                     whead_ref, bhead_ref,
                     out_ref, *, n_ctx):
    TBN, C = x_ref.shape
    TB = TBN // n_ctx
    H = ws_ref.shape[1]

    xb = x_ref[...]                                    # (TB*N, C) bf16, streamed

    # ---- per-head attention scores for the single latent query ----
    # pre_projection, the k half of kv, wq, the 1/sqrt(head_dim) scale and the
    # per-head reduce are all folded host-side into ws / bs.
    s = jnp.dot(xb, ws_ref[...], preferred_element_type=jnp.float32) + bs_ref[...]
    s = s.reshape(TB, n_ctx, H)
    m = jnp.max(s, axis=1, keepdims=True)              # (TB, 1, H)
    p = jnp.exp(s - m)
    p = p * pl.reciprocal(jnp.sum(p, axis=1, keepdims=True), approx=True)

    # ---- v projection (bv folded into the attention-output bias) ----
    v = jnp.dot(xb, wv_ref[...], preferred_element_type=jnp.float32)    # (TB*N, C)

    # ---- expand per-head probs onto lanes and pool over the context axis ----
    p_exp = jnp.dot(p.reshape(TBN, H).astype(jnp.bfloat16), et_ref[...],
                    preferred_element_type=jnp.float32)                 # (TB*N, C)
    o = jnp.sum((p_exp * v).reshape(TB, n_ctx, C), axis=1)              # (TB, C)

    # ---- attention output projection; bias = bproj + bv@wproj + latents ----
    h1 = _rms_norm(
        jnp.dot(o.astype(jnp.bfloat16), wproj_ref[...],
                preferred_element_type=jnp.float32) + battn_ref[...],
        g_attn_ref[...])                                                # (TB, C)

    # ---- MLP: SwishGLU(C -> Hm) then Linear(Hm -> C) ----
    h1b = h1.astype(jnp.bfloat16)
    proj = jnp.dot(h1b, w1p_ref[...], preferred_element_type=jnp.float32) + b1p_ref[...]
    gate = jnp.dot(h1b, w1g_ref[...], preferred_element_type=jnp.float32) + b1g_ref[...]
    glu = proj * jax.nn.silu(gate)
    mlp = jnp.dot(glu.astype(jnp.bfloat16), w2_ref[...],
                  preferred_element_type=jnp.float32) + b2_ref[...]

    h2 = _rms_norm(h1 + mlp, g_mlp_ref[...])                            # (TB, C)

    # ---- fused, lane-padded mu|var output heads (unmasked store) ----
    out = jnp.dot(h2.astype(jnp.bfloat16), whead_ref[...],
                  preferred_element_type=jnp.float32) + bhead_ref[...]
    out_ref[...] = out.astype(out_ref.dtype)


def _plan_tiling(B, N, C, Hm, P, weight_bytes):
    """Generation-aware batch tile, padded batch and vmem limit."""
    try:
        vmem_cap = pltpu.get_tpu_info().vmem_capacity_bytes
    except Exception:
        vmem_cap = 64 * 1024 * 1024            # conservative v7x per-core floor
    # ~48 MiB on v7x (64 MiB/TC), ~96 MiB on v5e/v6e (128 MiB physical).
    vmem_limit = min(int(vmem_cap * 3 // 4), 96 * 1024 * 1024)

    # Per-batch-row working set: double-buffered bf16 x tile + fp32 v / p_exp /
    # (p_exp*v) intermediates + small per-row activations + output tile.
    row_bytes = 16 * N * C + 8 * (2 * Hm + 4 * C + P) + 512
    # Resident weights may be double-buffered if Buffered(1) is unsupported.
    tile_budget = max(vmem_limit - 2 * weight_bytes - (2 << 20), 8 * row_bytes)

    tb = min(B, tile_budget // row_bytes)
    tb = max(8, (tb // 8) * 8)
    if B >= 16:
        # Keep >= 2 grid steps so both v7x TensorCores get work and the x DMA of
        # step i+1 overlaps the compute of step i.
        tb = min(tb, max(8, (B // 2) // 8 * 8))
    if tb >= B:
        tb = B                                  # small batch: one full-batch step
    b_pad = ((B + tb - 1) // tb) * tb           # pad instead of falling back to B
    return tb, b_pad, vmem_limit


def map_block_2head(x, latents, params, n_heads):
    """Forward of MAPBlock_2head; everything except cheap one-time host-side
    weight folding runs inside a single batch-tiled Pallas kernel."""
    B, N, C = x.shape
    L = latents.shape[0]
    assert L == 1, "squeeze(dim=1) in the reference forward requires n_latents == 1"
    hd = C // n_heads
    D = params['wmu'].shape[1]
    Hm = params['wmlp2'].shape[0]
    f32, bf16 = jnp.float32, jnp.bfloat16

    # ---- host-side parameter folding (tiny, done once) ----
    # pre_projection folded into the kv projection.
    wkv_f = params['wpre'].astype(f32) @ params['wkv'].astype(f32)          # (C, 2C)
    bkv_f = params['bpre'].astype(f32) @ params['wkv'].astype(f32) + params['bkv']
    wk, wv = wkv_f[:, :C], wkv_f[:, C:]
    bk, bv = bkv_f[:, :C], bkv_f[:, C:]

    # Single latent query with wq and the SDPA scale folded in.
    q1 = (latents.astype(f32) @ params['wq'] + params['bq']) * (hd ** -0.5)  # (1, C)

    # Head-indicator matrix (lane c belongs to head c // hd).
    E = (jnp.arange(C)[:, None] // hd == jnp.arange(n_heads)[None, :]).astype(f32)

    # Entire k path folded to a (C, H) score projection: s = x @ ws + bs.
    ws = (wk @ (E * q1.T)).astype(bf16)                                      # (C, H)
    bs = ((bk * q1) @ E).astype(f32)                                         # (1, H)
    et = E.T.astype(bf16)                                                    # (H, C)

    # v-bias, output-projection bias and the latent residual folded together:
    # latents + (o + bv) @ wproj + bproj == o @ wproj + battn   (softmax sums to 1).
    wproj = params['wproj'].astype(bf16)
    battn = (latents.astype(f32) + bv @ params['wproj'].astype(f32)
             + params['bproj']).astype(f32)                                  # (1, C)

    # SwishGLU weights split so there is no lane slicing in the kernel.
    w1p, b1p = params['wmlp1'][:, :Hm].astype(bf16), params['bmlp1'][:, :Hm].astype(f32)
    w1g, b1g = params['wmlp1'][:, Hm:].astype(bf16), params['bmlp1'][:, Hm:].astype(f32)
    w2, b2 = params['wmlp2'].astype(bf16), params['bmlp2'].astype(f32)

    # mu|var heads fused and zero-padded to a 128-lane multiple (unmasked store).
    P = max(128, ((2 * D + 127) // 128) * 128)
    w_head = jnp.pad(jnp.concatenate([params['wmu'], params['wvar']], axis=1),
                     ((0, 0), (0, P - 2 * D))).astype(bf16)                  # (C, P)
    b_head = jnp.pad(jnp.concatenate([params['bmu'], params['bvar']], axis=1),
                     ((0, 0), (0, P - 2 * D))).astype(f32)                   # (1, P)

    weights = (ws, bs, wv.astype(bf16), et,
               wproj, battn, params['g_attn'].astype(f32),
               w1p, b1p, w1g, b1g, w2, b2, params['g_mlp'].astype(f32),
               w_head, b_head)
    weight_bytes = sum(int(w.size) * w.dtype.itemsize for w in weights)

    tb, b_pad, vmem_limit = _plan_tiling(B, N, C, Hm, P, weight_bytes)

    # Stream x as bf16 (halves HBM->VMEM DMA) and pre-flatten so the kernel never
    # reshapes the streamed tile.  N % 8 == 0 (and ideally C % 128 == 0) keeps the
    # in-kernel (TB*N, .) -> (TB, N, .) views relayout-free.
    xb = x.astype(bf16)
    if b_pad != B:
        xb = jnp.pad(xb, ((0, b_pad - B), (0, 0), (0, 0)))
    x_flat = xb.reshape(b_pad * N, C)

    kernel = functools.partial(map_block_kernel, n_ctx=N)
    x_spec = pl.BlockSpec((tb * N, C), lambda i: (i, 0))
    out_spec = pl.BlockSpec((tb, P), lambda i: (i, 0))

    def run(single_buffer_weights):
        if single_buffer_weights:
            # Resident weights (constant index map) do not need double buffers.
            w_specs = [pl.BlockSpec(w.shape, lambda i: (0, 0),
                                    pipeline_mode=pl.Buffered(1)) for w in weights]
        else:
            w_specs = [pl.BlockSpec(w.shape, lambda i: (0, 0)) for w in weights]
        return pl.pallas_call(
            kernel,
            out_shape=jax.ShapeDtypeStruct((b_pad, P), jnp.float32),
            grid=(b_pad // tb,),
            in_specs=[x_spec] + w_specs,
            out_specs=out_spec,
            compiler_params=pltpu.CompilerParams(
                dimension_semantics=("parallel",),
                vmem_limit_bytes=vmem_limit),
        )(x_flat, *weights)

    try:
        out = run(True)
    except Exception:
        # pl.Buffered(1) not accepted by this jax build for top-level pallas_call
        # pipelining -> fall back to default double-buffered resident weights.
        out = run(False)

    return out[:B, :D], out[:B, D:2 * D]


def reference(x, latents, p, n_heads):
    """Pure-JAX fp32 reference mirroring the PyTorch forward."""
    B, N, C = x.shape
    L = latents.shape[0]
    hd = C // n_heads
    kv_in = x @ p['wpre'] + p['bpre']
    q_in = jnp.broadcast_to(latents[None], (B, L, C))
    kv = kv_in @ p['wkv'] + p['bkv']
    k, v = kv[..., :C], kv[..., C:]
    q = q_in @ p['wq'] + p['bq']
    qh = q.reshape(B, L, n_heads, hd).transpose(0, 2, 1, 3)
    kh = k.reshape(B, N, n_heads, hd).transpose(0, 2, 1, 3)
    vh = v.reshape(B, N, n_heads, hd).transpose(0, 2, 1, 3)
    s = jnp.einsum('bhld,bhnd->bhln', qh, kh) / (hd ** 0.5)
    a = jax.nn.softmax(s, axis=-1)
    o = jnp.einsum('bhln,bhnd->bhld', a, vh).transpose(0, 2, 1, 3).reshape(B, L, C)
    attn = o @ p['wproj'] + p['bproj']

    def rms(t, g):
        norm = jnp.sqrt(jnp.sum(t * t, -1, keepdims=True)) * (t.shape[-1] ** -0.5)
        return t / jnp.maximum(norm, 1e-8) * g

    h1 = rms(q_in + attn, p['g_attn'])
    proj = h1 @ p['wmlp1'] + p['bmlp1']
    Hm = p['wmlp2'].shape[0]
    glu = proj[..., :Hm] * jax.nn.silu(proj[..., Hm:])
    h2 = rms(h1 + glu @ p['wmlp2'] + p['bmlp2'], p['g_mlp'])
    pooled = h2[:, 0, :]
    return pooled @ p['wmu'] + p['bmu'], pooled @ p['wvar'] + p['bvar']


if __name__ == "__main__":
    # Small shapes consistent with the module.
    B, N, C = 2, 8, 32          # batch, kv sequence length, embed_dim
    n_heads = 4
    n_latents = 1               # squeeze(dim=1) requires n_latents == 1
    output_dim = 16
    mlp_hidden = int(4.0 * C)   # mlp_ratio = 4.0 -> 128

    key = jax.random.PRNGKey(0)
    ks = jax.random.split(key, 24)

    def w(k, shape, scale=0.02):
        return jax.random.normal(k, shape, jnp.float32) * scale

    x = jax.random.normal(ks[0], (B, N, C), jnp.float32)
    latents = w(ks[1], (n_latents, C))                    # nn.init.normal_(std=0.02)

    params = dict(
        wpre=w(ks[2], (C, C)),            bpre=w(ks[3], (1, C)),
        wkv=w(ks[4], (C, 2 * C)),         bkv=w(ks[5], (1, 2 * C)),
        wq=w(ks[6], (C, C)),              bq=w(ks[7], (1, C)),
        wproj=w(ks[8], (C, C)),           bproj=w(ks[9], (1, C)),
        g_attn=jnp.ones((1, C), jnp.float32),
        wmlp1=w(ks[10], (C, 2 * mlp_hidden)), bmlp1=w(ks[11], (1, 2 * mlp_hidden)),
        wmlp2=w(ks[12], (mlp_hidden, C)),     bmlp2=w(ks[13], (1, C)),
        g_mlp=jnp.ones((1, C), jnp.float32),
        wmu=w(ks[14], (C, output_dim)),   bmu=w(ks[15], (1, output_dim)),
        wvar=w(ks[16], (C, output_dim)),  bvar=w(ks[17], (1, output_dim)),
    )

    mu, var = map_block_2head(x, latents, params, n_heads)
    jax.block_until_ready((mu, var))

    mu_ref, var_ref = reference(x, latents, params, n_heads)
    np.testing.assert_allclose(np.asarray(mu), np.asarray(mu_ref), rtol=5e-2, atol=5e-3)
    np.testing.assert_allclose(np.asarray(var), np.asarray(var_ref), rtol=5e-2, atol=5e-3)

    print("KERNEL_OK")
</pallas_src>

<mosaic_0001>
module attributes {stable_mosaic.version = 11 : i64} {
  func.func @map_block_kernel(%arg0: i32, %arg1: memref<16x32xbf16, #tpu.memory_space<vmem>>, %arg2: memref<32x4xbf16, #tpu.memory_space<vmem>>, %arg3: memref<1x4xf32, #tpu.memory_space<vmem>>, %arg4: memref<32x32xbf16, #tpu.memory_space<vmem>>, %arg5: memref<4x32xbf16, #tpu.memory_space<vmem>>, %arg6: memref<32x32xbf16, #tpu.memory_space<vmem>>, %arg7: memref<1x32xf32, #tpu.memory_space<vmem>>, %arg8: memref<1x32xf32, #tpu.memory_space<vmem>>, %arg9: memref<32x128xbf16, #tpu.memory_space<vmem>>, %arg10: memref<1x128xf32, #tpu.memory_space<vmem>>, %arg11: memref<32x128xbf16, #tpu.memory_space<vmem>>, %arg12: memref<1x128xf32, #tpu.memory_space<vmem>>, %arg13: memref<128x32xbf16, #tpu.memory_space<vmem>>, %arg14: memref<1x32xf32, #tpu.memory_space<vmem>>, %arg15: memref<1x32xf32, #tpu.memory_space<vmem>>, %arg16: memref<32x128xbf16, #tpu.memory_space<vmem>>, %arg17: memref<1x128xf32, #tpu.memory_space<vmem>>, %arg18: memref<2x128xf32, #tpu.memory_space<vmem>>) attributes {dimension_semantics = [#tpu.dimension_semantics<parallel>], iteration_bounds = array<i64: 1>, scalar_prefetch = 0 : i64, scratch_operands = 0 : i64, tpu.core_type = #tpu.core_type<tc>, window_params = [{transform_indices = @transform_0, window_bounds = array<i64: 16, 32>}, {pipeline_mode = #tpu.pipeline_mode<synchronous>, transform_indices = @transform_1, window_bounds = array<i64: 32, 4>}, {pipeline_mode = #tpu.pipeline_mode<synchronous>, transform_indices = @transform_2, window_bounds = array<i64: 1, 4>}, {pipeline_mode = #tpu.pipeline_mode<synchronous>, transform_indices = @transform_3, window_bounds = array<i64: 32, 32>}, {pipeline_mode = #tpu.pipeline_mode<synchronous>, transform_indices = @transform_4, window_bounds = array<i64: 4, 32>}, {pipeline_mode = #tpu.pipeline_mode<synchronous>, transform_indices = @transform_5, window_bounds = array<i64: 32, 32>}, {pipeline_mode = #tpu.pipeline_mode<synchronous>, transform_indices = @transform_6, window_bounds = array<i64: 1, 32>}, {pipeline_mode = #tpu.pipeline_mode<synchronous>, transform_indices = @transform_7, window_bounds = array<i64: 1, 32>}, {pipeline_mode = #tpu.pipeline_mode<synchronous>, transform_indices = @transform_8, window_bounds = array<i64: 32, 128>}, {pipeline_mode = #tpu.pipeline_mode<synchronous>, transform_indices = @transform_9, window_bounds = array<i64: 1, 128>}, {pipeline_mode = #tpu.pipeline_mode<synchronous>, transform_indices = @transform_10, window_bounds = array<i64: 32, 128>}, {pipeline_mode = #tpu.pipeline_mode<synchronous>, transform_indices = @transform_11, window_bounds = array<i64: 1, 128>}, {pipeline_mode = #tpu.pipeline_mode<synchronous>, transform_indices = @transform_12, window_bounds = array<i64: 128, 32>}, {pipeline_mode = #tpu.pipeline_mode<synchronous>, transform_indices = @transform_13, window_bounds = array<i64: 1, 32>}, {pipeline_mode = #tpu.pipeline_mode<synchronous>, transform_indices = @transform_14, window_bounds = array<i64: 1, 32>}, {pipeline_mode = #tpu.pipeline_mode<synchronous>, transform_indices = @transform_15, window_bounds = array<i64: 32, 128>}, {pipeline_mode = #tpu.pipeline_mode<synchronous>, transform_indices = @transform_16, window_bounds = array<i64: 1, 128>}, {transform_indices = @transform_17, window_bounds = array<i64: 2, 128>}]} {
    %c0 = arith.constant 0 : index
    %c0_0 = arith.constant 0 : index
    %0 = vector.load %arg1[%c0, %c0_0] : memref<16x32xbf16, #tpu.memory_space<vmem>>, vector<16x32xbf16>
    %c0_1 = arith.constant 0 : index
    %c0_2 = arith.constant 0 : index
    %1 = vector.load %arg2[%c0_1, %c0_2] : memref<32x4xbf16, #tpu.memory_space<vmem>>, vector<32x4xbf16>
    %cst = arith.constant dense<0.000000e+00> : vector<16x4xf32>
    %2 = tpu.matmul %0, %1, %cst {dimension_numbers = #tpu.dot_dimension_numbers<[1], [0], [0], [1], [0, 0, 1, 1], [], []>} : vector<16x32xbf16>, vector<32x4xbf16>, vector<16x4xf32> -> vector<16x4xf32>
    %c0_3 = arith.constant 0 : index
    %c0_4 = arith.constant 0 : index
    %3 = vector.load %arg3[%c0_3, %c0_4] : memref<1x4xf32, #tpu.memory_space<vmem>>, vector<1x4xf32>
    %4 = vector.broadcast %3 : vector<1x4xf32> to vector<16x4xf32>
    %5 = arith.addf %2, %4 : vector<16x4xf32>
    %6 = vector.shape_cast %5 : vector<16x4xf32> to vector<2x8x4xf32>
    %cst_5 = arith.constant dense<0xFF800000> : vector<2x4xf32>
    %7 = vector.multi_reduction <maximumf>, %6, %cst_5 [1] : vector<2x8x4xf32> to vector<2x4xf32>
    %8 = vector.shape_cast %7 : vector<2x4xf32> to vector<2x1x4xf32>
    %9 = vector.broadcast %8 : vector<2x1x4xf32> to vector<2x8x4xf32>
    %10 = arith.subf %6, %9 : vector<2x8x4xf32>
    %11 = math.exp %10 : vector<2x8x4xf32>
    %cst_6 = arith.constant dense<0.000000e+00> : vector<2x4xf32>
    %12 = vector.multi_reduction <add>, %11, %cst_6 [1] : vector<2x8x4xf32> to vector<2x4xf32>
    %13 = vector.shape_cast %12 : vector<2x4xf32> to vector<2x1x4xf32>
    %14 = tpu.reciprocal %13 {approx = true} : vector<2x1x4xf32> -> vector<2x1x4xf32>
    %15 = vector.broadcast %14 : vector<2x1x4xf32> to vector<2x8x4xf32>
    %16 = arith.mulf %11, %15 : vector<2x8x4xf32>
    %c0_7 = arith.constant 0 : index
    %c0_8 = arith.constant 0 : index
    %17 = vector.load %arg4[%c0_7, %c0_8] : memref<32x32xbf16, #tpu.memory_space<vmem>>, vector<32x32xbf16>
    %cst_9 = arith.constant dense<0.000000e+00> : vector<16x32xf32>
    %18 = tpu.matmul %0, %17, %cst_9 {dimension_numbers = #tpu.dot_dimension_numbers<[1], [0], [0], [1], [0, 0, 1, 1], [], []>} : vector<16x32xbf16>, vector<32x32xbf16>, vector<16x32xf32> -> vector<16x32xf32>
    %19 = vector.shape_cast %16 : vector<2x8x4xf32> to vector<16x4xf32>
    %20 = arith.truncf %19 : vector<16x4xf32> to vector<16x4xbf16>
    %c0_10 = arith.constant 0 : index
    %c0_11 = arith.constant 0 : index
    %21 = vector.load %arg5[%c0_10, %c0_11] : memref<4x32xbf16, #tpu.memory_space<vmem>>, vector<4x32xbf16>
    %cst_12 = arith.constant dense<0.000000e+00> : vector<16x32xf32>
    %22 = tpu.matmul %20, %21, %cst_12 {dimension_numbers = #tpu.dot_dimension_numbers<[1], [0], [0], [1], [0, 0, 1, 1], [], []>} : vector<16x4xbf16>, vector<4x32xbf16>, vector<16x32xf32> -> vector<16x32xf32>
    %23 = arith.mulf %22, %18 : vector<16x32xf32>
    %24 = vector.shape_cast %23 : vector<16x32xf32> to vector<2x8x32xf32>
    %cst_13 = arith.constant dense<0.000000e+00> : vector<2x32xf32>
    %25 = vector.multi_reduction <add>, %24, %cst_13 [1] : vector<2x8x32xf32> to vector<2x32xf32>
    %26 = arith.truncf %25 : vector<2x32xf32> to vector<2x32xbf16>
    %c0_14 = arith.constant 0 : index
    %c0_15 = arith.constant 0 : index
    %27 = vector.load %arg6[%c0_14, %c0_15] : memref<32x32xbf16, #tpu.memory_space<vmem>>, vector<32x32xbf16>
    %cst_16 = arith.constant dense<0.000000e+00> : vector<2x32xf32>
    %28 = tpu.matmul %26, %27, %cst_16 {dimension_numbers = #tpu.dot_dimension_numbers<[1], [0], [0], [1], [0, 0, 1, 1], [], []>} : vector<2x32xbf16>, vector<32x32xbf16>, vector<2x32xf32> -> vector<2x32xf32>
    %c0_17 = arith.constant 0 : index
    %c0_18 = arith.constant 0 : index
    %29 = vector.load %arg7[%c0_17, %c0_18] : memref<1x32xf32, #tpu.memory_space<vmem>>, vector<1x32xf32>
    %30 = vector.broadcast %29 : vector<1x32xf32> to vector<2x32xf32>
    %31 = arith.addf %28, %30 : vector<2x32xf32>
    %c0_19 = arith.constant 0 : index
    %c0_20 = arith.constant 0 : index
    %32 = vector.load %arg8[%c0_19, %c0_20] : memref<1x32xf32, #tpu.memory_space<vmem>>, vector<1x32xf32>
    %33 = arith.mulf %31, %31 : vector<2x32xf32>
    %cst_21 = arith.constant dense<0.000000e+00> : vector<2xf32>
    %34 = vector.multi_reduction <add>, %33, %cst_21 [1] : vector<2x32xf32> to vector<2xf32>
    %35 = vector.shape_cast %34 : vector<2xf32> to vector<2x1xf32>
    %36 = math.rsqrt %35 : vector<2x1xf32>
    %cst_22 = arith.constant 5.65685415 : f32
    %37 = vector.broadcast %cst_22 : f32 to vector<2x1xf32>
    %38 = arith.mulf %36, %37 : vector<2x1xf32>
    %cst_23 = arith.constant 1.000000e+08 : f32
    %39 = vector.broadcast %cst_23 : f32 to vector<2x1xf32>
    %40 = arith.minimumf %38, %39 : vector<2x1xf32>
    %41 = vector.broadcast %40 : vector<2x1xf32> to vector<2x32xf32>
    %42 = arith.mulf %31, %41 : vector<2x32xf32>
    %43 = vector.broadcast %32 : vector<1x32xf32> to vector<2x32xf32>
    %44 = arith.mulf %42, %43 : vector<2x32xf32>
    %45 = arith.truncf %44 : vector<2x32xf32> to vector<2x32xbf16>
    %c0_24 = arith.constant 0 : index
    %c0_25 = arith.constant 0 : index
    %46 = vector.load %arg9[%c0_24, %c0_25] : memref<32x128xbf16, #tpu.memory_space<vmem>>, vector<32x128xbf16>
    %cst_26 = arith.constant dense<0.000000e+00> : vector<2x128xf32>
    %47 = tpu.matmul %45, %46, %cst_26 {dimension_numbers = #tpu.dot_dimension_numbers<[1], [0], [0], [1], [0, 0, 1, 1], [], []>} : vector<2x32xbf16>, vector<32x128xbf16>, vector<2x128xf32> -> vector<2x128xf32>
    %c0_27 = arith.constant 0 : index
    %c0_28 = arith.constant 0 : index
    %48 = vector.load %arg10[%c0_27, %c0_28] : memref<1x128xf32, #tpu.memory_space<vmem>>, vector<1x128xf32>
    %49 = vector.broadcast %48 : vector<1x128xf32> to vector<2x128xf32>
    %50 = arith.addf %47, %49 : vector<2x128xf32>
    %c0_29 = arith.constant 0 : index
    %c0_30 = arith.constant 0 : index
    %51 = vector.load %arg11[%c0_29, %c0_30] : memref<32x128xbf16, #tpu.memory_space<vmem>>, vector<32x128xbf16>
    %cst_31 = arith.constant dense<0.000000e+00> : vector<2x128xf32>
    %52 = tpu.matmul %45, %51, %cst_31 {dimension_numbers = #tpu.dot_dimension_numbers<[1], [0], [0], [1], [0, 0, 1, 1], [], []>} : vector<2x32xbf16>, vector<32x128xbf16>, vector<2x128xf32> -> vector<2x128xf32>
    %c0_32 = arith.constant 0 : index
    %c0_33 = arith.constant 0 : index
    %53 = vector.load %arg12[%c0_32, %c0_33] : memref<1x128xf32, #tpu.memory_space<vmem>>, vector<1x128xf32>
    %54 = vector.broadcast %53 : vector<1x128xf32> to vector<2x128xf32>
    %55 = arith.addf %52, %54 : vector<2x128xf32>
    %56 = arith.negf %55 : vector<2x128xf32>
    %57 = math.exp %56 : vector<2x128xf32>
    %cst_34 = arith.constant 1.000000e+00 : f32
    %58 = vector.broadcast %cst_34 : f32 to vector<2x128xf32>
    %59 = arith.addf %58, %57 : vector<2x128xf32>
    %60 = arith.divf %58, %59 : vector<2x128xf32>
    %61 = arith.mulf %55, %60 : vector<2x128xf32>
    %62 = arith.mulf %50, %61 : vector<2x128xf32>
    %63 = arith.truncf %62 : vector<2x128xf32> to vector<2x128xbf16>
    %c0_35 = arith.constant 0 : index
    %c0_36 = arith.constant 0 : index
    %64 = vector.load %arg13[%c0_35, %c0_36] : memref<128x32xbf16, #tpu.memory_space<vmem>>, vector<128x32xbf16>
    %cst_37 = arith.constant dense<0.000000e+00> : vector<2x32xf32>
    %65 = tpu.matmul %63, %64, %cst_37 {dimension_numbers = #tpu.dot_dimension_numbers<[1], [0], [0], [1], [0, 0, 1, 1], [], []>} : vector<2x128xbf16>, vector<128x32xbf16>, vector<2x32xf32> -> vector<2x32xf32>
    %c0_38 = arith.constant 0 : index
    %c0_39 = arith.constant 0 : index
    %66 = vector.load %arg14[%c0_38, %c0_39] : memref<1x32xf32, #tpu.memory_space<vmem>>, vector<1x32xf32>
    %67 = vector.broadcast %66 : vector<1x32xf32> to vector<2x32xf32>
    %68 = arith.addf %65, %67 : vector<2x32xf32>
    %69 = arith.addf %44, %68 : vector<2x32xf32>
    %c0_40 = arith.constant 0 : index
    %c0_41 = arith.constant 0 : index
    %70 = vector.load %arg15[%c0_40, %c0_41] : memref<1x32xf32, #tpu.memory_space<vmem>>, vector<1x32xf32>
    %71 = arith.mulf %69, %69 : vector<2x32xf32>
    %cst_42 = arith.constant dense<0.000000e+00> : vector<2xf32>
    %72 = vector.multi_reduction <add>, %71, %cst_42 [1] : vector<2x32xf32> to vector<2xf32>
    %73 = vector.shape_cast %72 : vector<2xf32> to vector<2x1xf32>
    %74 = math.rsqrt %73 : vector<2x1xf32>
    %cst_43 = arith.constant 5.65685415 : f32
    %75 = vector.broadcast %cst_43 : f32 to vector<2x1xf32>
    %76 = arith.mulf %74, %75 : vector<2x1xf32>
    %cst_44 = arith.constant 1.000000e+08 : f32
    %77 = vector.broadcast %cst_44 : f32 to vector<2x1xf32>
    %78 = arith.minimumf %76, %77 : vector<2x1xf32>
    %79 = vector.broadcast %78 : vector<2x1xf32> to vector<2x32xf32>
    %80 = arith.mulf %69, %79 : vector<2x32xf32>
    %81 = vector.broadcast %70 : vector<1x32xf32> to vector<2x32xf32>
    %82 = arith.mulf %80, %81 : vector<2x32xf32>
    %83 = arith.truncf %82 : vector<2x32xf32> to vector<2x32xbf16>
    %c0_45 = arith.constant 0 : index
    %c0_46 = arith.constant 0 : index
    %84 = vector.load %arg16[%c0_45, %c0_46] : memref<32x128xbf16, #tpu.memory_space<vmem>>, vector<32x128xbf16>
    %cst_47 = arith.constant dense<0.000000e+00> : vector<2x128xf32>
    %85 = tpu.matmul %83, %84, %cst_47 {dimension_numbers = #tpu.dot_dimension_numbers<[1], [0], [0], [1], [0, 0, 1, 1], [], []>} : vector<2x32xbf16>, vector<32x128xbf16>, vector<2x128xf32> -> vector<2x128xf32>
    %c0_48 = arith.constant 0 : index
    %c0_49 = arith.constant 0 : index
    %86 = vector.load %arg17[%c0_48, %c0_49] : memref<1x128xf32, #tpu.memory_space<vmem>>, vector<1x128xf32>
    %87 = vector.broadcast %86 : vector<1x128xf32> to vector<2x128xf32>
    %88 = arith.addf %85, %87 : vector<2x128xf32>
    %c0_50 = arith.constant 0 : index
    %c0_51 = arith.constant 0 : index
    %89 = vector.load %arg18[%c0_50, %c0_51] : memref<2x128xf32, #tpu.memory_space<vmem>>, vector<2x128xf32>
    tpu.vector_store %arg18[%c0_50, %c0_51], %88 {strides = array<i32>} : memref<2x128xf32, #tpu.memory_space<vmem>>, vector<2x128xf32>,
    return
  }
  func.func @transform_0(%arg0: i32) -> (i32, i32) {
    %c0_i32 = arith.constant 0 : i32
    %c0_i32_0 = arith.constant 0 : i32
    return %arg0, %c0_i32 : i32, i32
  }
  func.func @transform_1(%arg0: i32) -> (i32, i32) {
    %c0_i32 = arith.constant 0 : i32
    %c0_i32_0 = arith.constant 0 : i32
    %c0_i32_1 = arith.constant 0 : i32
    return %c0_i32, %c0_i32_0 : i32, i32
  }
  func.func @transform_2(%arg0: i32) -> (i32, i32) {
    %c0_i32 = arith.constant 0 : i32
    %c0_i32_0 = arith.constant 0 : i32
    %c0_i32_1 = arith.constant 0 : i32
    return %c0_i32, %c0_i32_0 : i32, i32
  }
  func.func @transform_3(%arg0: i32) -> (i32, i32) {
    %c0_i32 = arith.constant 0 : i32
    %c0_i32_0 = arith.constant 0 : i32
    %c0_i32_1 = arith.constant 0 : i32
    return %c0_i32, %c0_i32_0 : i32, i32
  }
  func.func @transform_4(%arg0: i32) -> (i32, i32) {
    %c0_i32 = arith.constant 0 : i32
    %c0_i32_0 = arith.constant 0 : i32
    %c0_i32_1 = arith.constant 0 : i32
    return %c0_i32, %c0_i32_0 : i32, i32
  }
  func.func @transform_5(%arg0: i32) -> (i32, i32) {
    %c0_i32 = arith.constant 0 : i32
    %c0_i32_0 = arith.constant 0 : i32
    %c0_i32_1 = arith.constant 0 : i32
    return %c0_i32, %c0_i32_0 : i32, i32
  }
  func.func @transform_6(%arg0: i32) -> (i32, i32) {
    %c0_i32 = arith.constant 0 : i32
    %c0_i32_0 = arith.constant 0 : i32
    %c0_i32_1 = arith.constant 0 : i32
    return %c0_i32, %c0_i32_0 : i32, i32
  }
  func.func @transform_7(%arg0: i32) -> (i32, i32) {
    %c0_i32 = arith.constant 0 : i32
    %c0_i32_0 = arith.constant 0 : i32
    %c0_i32_1 = arith.constant 0 : i32
    return %c0_i32, %c0_i32_0 : i32, i32
  }
  func.func @transform_8(%arg0: i32) -> (i32, i32) {
    %c0_i32 = arith.constant 0 : i32
    %c0_i32_0 = arith.constant 0 : i32
    %c0_i32_1 = arith.constant 0 : i32
    return %c0_i32, %c0_i32_0 : i32, i32
  }
  func.func @transform_9(%arg0: i32) -> (i32, i32) {
    %c0_i32 = arith.constant 0 : i32
    %c0_i32_0 = arith.constant 0 : i32
    %c0_i32_1 = arith.constant 0 : i32
    return %c0_i32, %c0_i32_0 : i32, i32
  }
  func.func @transform_10(%arg0: i32) -> (i32, i32) {
    %c0_i32 = arith.constant 0 : i32
    %c0_i32_0 = arith.constant 0 : i32
    %c0_i32_1 = arith.constant 0 : i32
    return %c0_i32, %c0_i32_0 : i32, i32
  }
  func.func @transform_11(%arg0: i32) -> (i32, i32) {
    %c0_i32 = arith.constant 0 : i32
    %c0_i32_0 = arith.constant 0 : i32
    %c0_i32_1 = arith.constant 0 : i32
    return %c0_i32, %c0_i32_0 : i32, i32
  }
  func.func @transform_12(%arg0: i32) -> (i32, i32) {
    %c0_i32 = arith.constant 0 : i32
    %c0_i32_0 = arith.constant 0 : i32
    %c0_i32_1 = arith.constant 0 : i32
    return %c0_i32, %c0_i32_0 : i32, i32
  }
  func.func @transform_13(%arg0: i32) -> (i32, i32) {
    %c0_i32 = arith.constant 0 : i32
    %c0_i32_0 = arith.constant 0 : i32
    %c0_i32_1 = arith.constant 0 : i32
    return %c0_i32, %c0_i32_0 : i32, i32
  }
  func.func @transform_14(%arg0: i32) -> (i32, i32) {
    %c0_i32 = arith.constant 0 : i32
    %c0_i32_0 = arith.constant 0 : i32
    %c0_i32_1 = arith.constant 0 : i32
    return %c0_i32, %c0_i32_0 : i32, i32
  }
  func.func @transform_15(%arg0: i32) -> (i32, i32) {
    %c0_i32 = arith.constant 0 : i32
    %c0_i32_0 = arith.constant 0 : i32
    %c0_i32_1 = arith.constant 0 : i32
    return %c0_i32, %c0_i32_0 : i32, i32
  }
  func.func @transform_16(%arg0: i32) -> (i32, i32) {
    %c0_i32 = arith.constant 0 : i32
    %c0_i32_0 = arith.constant 0 : i32
    %c0_i32_1 = arith.constant 0 : i32
    return %c0_i32, %c0_i32_0 : i32, i32
  }
  func.func @transform_17(%arg0: i32) -> (i32, i32) {
    %c0_i32 = arith.constant 0 : i32
    %c0_i32_0 = arith.constant 0 : i32
    return %arg0, %c0_i32 : i32, i32
  }
}

module attributes {stable_mosaic.version = 11 : i64} {
  func.func @map_block_kernel(%arg0: i32, %arg1: memref<16x32xbf16, #tpu.memory_space<vmem>>, %arg2: memref<32x4xbf16, #tpu.memory_space<vmem>>, %arg3: memref<1x4xf32, #tpu.memory_space<vmem>>, %arg4: memref<32x32xbf16, #tpu.memory_space<vmem>>, %arg5: memref<4x32xbf16, #tpu.memory_space<vmem>>, %arg6: memref<32x32xbf16, #tpu.memory_space<vmem>>, %arg7: memref<1x32xf32, #tpu.memory_space<vmem>>, %arg8: memref<1x32xf32, #tpu.memory_space<vmem>>, %arg9: memref<32x128xbf16, #tpu.memory_space<vmem>>, %arg10: memref<1x128xf32, #tpu.memory_space<vmem>>, %arg11: memref<32x128xbf16, #tpu.memory_space<vmem>>, %arg12: memref<1x128xf32, #tpu.memory_space<vmem>>, %arg13: memref<128x32xbf16, #tpu.memory_space<vmem>>, %arg14: memref<1x32xf32, #tpu.memory_space<vmem>>, %arg15: memref<1x32xf32, #tpu.memory_space<vmem>>, %arg16: memref<32x128xbf16, #tpu.memory_space<vmem>>, %arg17: memref<1x128xf32, #tpu.memory_space<vmem>>, %arg18: memref<2x128xf32, #tpu.memory_space<vmem>>) attributes {dimension_semantics = [#tpu.dimension_semantics<parallel>], iteration_bounds = array<i64: 1>, scalar_prefetch = 0 : i64, scratch_operands = 0 : i64, tpu.core_type = #tpu.core_type<tc>, window_params = [{transform_indices = @transform_0, window_bounds = array<i64: 16, 32>}, {pipeline_mode = #tpu.pipeline_mode<synchronous>, transform_indices = @transform_1, window_bounds = array<i64: 32, 4>}, {pipeline_mode = #tpu.pipeline_mode<synchronous>, transform_indices = @transform_2, window_bounds = array<i64: 1, 4>}, {pipeline_mode = #tpu.pipeline_mode<synchronous>, transform_indices = @transform_3, window_bounds = array<i64: 32, 32>}, {pipeline_mode = #tpu.pipeline_mode<synchronous>, transform_indices = @transform_4, window_bounds = array<i64: 4, 32>}, {pipeline_mode = #tpu.pipeline_mode<synchronous>, transform_indices = @transform_5, window_bounds = array<i64: 32, 32>}, {pipeline_mode = #tpu.pipeline_mode<synchronous>, transform_indices = @transform_6, window_bounds = array<i64: 1, 32>}, {pipeline_mode = #tpu.pipeline_mode<synchronous>, transform_indices = @transform_7, window_bounds = array<i64: 1, 32>}, {pipeline_mode = #tpu.pipeline_mode<synchronous>, transform_indices = @transform_8, window_bounds = array<i64: 32, 128>}, {pipeline_mode = #tpu.pipeline_mode<synchronous>, transform_indices = @transform_9, window_bounds = array<i64: 1, 128>}, {pipeline_mode = #tpu.pipeline_mode<synchronous>, transform_indices = @transform_10, window_bounds = array<i64: 32, 128>}, {pipeline_mode = #tpu.pipeline_mode<synchronous>, transform_indices = @transform_11, window_bounds = array<i64: 1, 128>}, {pipeline_mode = #tpu.pipeline_mode<synchronous>, transform_indices = @transform_12, window_bounds = array<i64: 128, 32>}, {pipeline_mode = #tpu.pipeline_mode<synchronous>, transform_indices = @transform_13, window_bounds = array<i64: 1, 32>}, {pipeline_mode = #tpu.pipeline_mode<synchronous>, transform_indices = @transform_14, window_bounds = array<i64: 1, 32>}, {pipeline_mode = #tpu.pipeline_mode<synchronous>, transform_indices = @transform_15, window_bounds = array<i64: 32, 128>}, {pipeline_mode = #tpu.pipeline_mode<synchronous>, transform_indices = @transform_16, window_bounds = array<i64: 1, 128>}, {transform_indices = @transform_17, window_bounds = array<i64: 2, 128>}]} {
    %c0 = arith.constant 0 : index
    %c0_0 = arith.constant 0 : index
    %0 = vector.load %arg1[%c0, %c0_0] : memref<16x32xbf16, #tpu.memory_space<vmem>>, vector<16x32xbf16>
    %c0_1 = arith.constant 0 : index
    %c0_2 = arith.constant 0 : index
    %1 = vector.load %arg2[%c0_1, %c0_2] : memref<32x4xbf16, #tpu.memory_space<vmem>>, vector<32x4xbf16>
    %cst = arith.constant dense<0.000000e+00> : vector<16x4xf32>
    %2 = tpu.matmul %0, %1, %cst {dimension_numbers = #tpu.dot_dimension_numbers<[1], [0], [0], [1], [0, 0, 1, 1], [], []>} : vector<16x32xbf16>, vector<32x4xbf16>, vector<16x4xf32> -> vector<16x4xf32>
    %c0_3 = arith.constant 0 : index
    %c0_4 = arith.constant 0 : index
    %3 = vector.load %arg3[%c0_3, %c0_4] : memref<1x4xf32, #tpu.memory_space<vmem>>, vector<1x4xf32>
    %4 = vector.broadcast %3 : vector<1x4xf32> to vector<16x4xf32>
    %5 = arith.addf %2, %4 : vector<16x4xf32>
    %6 = vector.shape_cast %5 : vector<16x4xf32> to vector<2x8x4xf32>
    %cst_5 = arith.constant dense<0xFF800000> : vector<2x4xf32>
    %7 = vector.multi_reduction <maximumf>, %6, %cst_5 [1] : vector<2x8x4xf32> to vector<2x4xf32>
    %8 = vector.shape_cast %7 : vector<2x4xf32> to vector<2x1x4xf32>
    %9 = vector.broadcast %8 : vector<2x1x4xf32> to vector<2x8x4xf32>
    %10 = arith.subf %6, %9 : vector<2x8x4xf32>
    %11 = math.exp %10 : vector<2x8x4xf32>
    %cst_6 = arith.constant dense<0.000000e+00> : vector<2x4xf32>
    %12 = vector.multi_reduction <add>, %11, %cst_6 [1] : vector<2x8x4xf32> to vector<2x4xf32>
    %13 = vector.shape_cast %12 : vector<2x4xf32> to vector<2x1x4xf32>
    %14 = tpu.reciprocal %13 {approx = true} : vector<2x1x4xf32> -> vector<2x1x4xf32>
    %15 = vector.broadcast %14 : vector<2x1x4xf32> to vector<2x8x4xf32>
    %16 = arith.mulf %11, %15 : vector<2x8x4xf32>
    %c0_7 = arith.constant 0 : index
    %c0_8 = arith.constant 0 : index
    %17 = vector.load %arg4[%c0_7, %c0_8] : memref<32x32xbf16, #tpu.memory_space<vmem>>, vector<32x32xbf16>
    %cst_9 = arith.constant dense<0.000000e+00> : vector<16x32xf32>
    %18 = tpu.matmul %0, %17, %cst_9 {dimension_numbers = #tpu.dot_dimension_numbers<[1], [0], [0], [1], [0, 0, 1, 1], [], []>} : vector<16x32xbf16>, vector<32x32xbf16>, vector<16x32xf32> -> vector<16x32xf32>
    %19 = vector.shape_cast %16 : vector<2x8x4xf32> to vector<16x4xf32>
    %20 = arith.truncf %19 : vector<16x4xf32> to vector<16x4xbf16>
    %c0_10 = arith.constant 0 : index
    %c0_11 = arith.constant 0 : index
    %21 = vector.load %arg5[%c0_10, %c0_11] : memref<4x32xbf16, #tpu.memory_space<vmem>>, vector<4x32xbf16>
    %cst_12 = arith.constant dense<0.000000e+00> : vector<16x32xf32>
    %22 = tpu.matmul %20, %21, %cst_12 {dimension_numbers = #tpu.dot_dimension_numbers<[1], [0], [0], [1], [0, 0, 1, 1], [], []>} : vector<16x4xbf16>, vector<4x32xbf16>, vector<16x32xf32> -> vector<16x32xf32>
    %23 = arith.mulf %22, %18 : vector<16x32xf32>
    %24 = vector.shape_cast %23 : vector<16x32xf32> to vector<2x8x32xf32>
    %cst_13 = arith.constant dense<0.000000e+00> : vector<2x32xf32>
    %25 = vector.multi_reduction <add>, %24, %cst_13 [1] : vector<2x8x32xf32> to vector<2x32xf32>
    %26 = arith.truncf %25 : vector<2x32xf32> to vector<2x32xbf16>
    %c0_14 = arith.constant 0 : index
    %c0_15 = arith.constant 0 : index
    %27 = vector.load %arg6[%c0_14, %c0_15] : memref<32x32xbf16, #tpu.memory_space<vmem>>, vector<32x32xbf16>
    %cst_16 = arith.constant dense<0.000000e+00> : vector<2x32xf32>
    %28 = tpu.matmul %26, %27, %cst_16 {dimension_numbers = #tpu.dot_dimension_numbers<[1], [0], [0], [1], [0, 0, 1, 1], [], []>} : vector<2x32xbf16>, vector<32x32xbf16>, vector<2x32xf32> -> vector<2x32xf32>
    %c0_17 = arith.constant 0 : index
    %c0_18 = arith.constant 0 : index
    %29 = vector.load %arg7[%c0_17, %c0_18] : memref<1x32xf32, #tpu.memory_space<vmem>>, vector<1x32xf32>
    %30 = vector.broadcast %29 : vector<1x32xf32> to vector<2x32xf32>
    %31 = arith.addf %28, %30 : vector<2x32xf32>
    %c0_19 = arith.constant 0 : index
    %c0_20 = arith.constant 0 : index
    %32 = vector.load %arg8[%c0_19, %c0_20] : memref<1x32xf32, #tpu.memory_space<vmem>>, vector<1x32xf32>
    %33 = arith.mulf %31, %31 : vector<2x32xf32>
    %cst_21 = arith.constant dense<0.000000e+00> : vector<2xf32>
    %34 = vector.multi_reduction <add>, %33, %cst_21 [1] : vector<2x32xf32> to vector<2xf32>
    %35 = vector.shape_cast %34 : vector<2xf32> to vector<2x1xf32>
    %36 = math.rsqrt %35 : vector<2x1xf32>
    %cst_22 = arith.constant 5.65685415 : f32
    %37 = vector.broadcast %cst_22 : f32 to vector<2x1xf32>
    %38 = arith.mulf %36, %37 : vector<2x1xf32>
    %cst_23 = arith.constant 1.000000e+08 : f32
    %39 = vector.broadcast %cst_23 : f32 to vector<2x1xf32>
    %40 = arith.minimumf %38, %39 : vector<2x1xf32>
    %41 = vector.broadcast %40 : vector<2x1xf32> to vector<2x32xf32>
    %42 = arith.mulf %31, %41 : vector<2x32xf32>
    %43 = vector.broadcast %32 : vector<1x32xf32> to vector<2x32xf32>
    %44 = arith.mulf %42, %43 : vector<2x32xf32>
    %45 = arith.truncf %44 : vector<2x32xf32> to vector<2x32xbf16>
    %c0_24 = arith.constant 0 : index
    %c0_25 = arith.constant 0 : index
    %46 = vector.load %arg9[%c0_24, %c0_25] : memref<32x128xbf16, #tpu.memory_space<vmem>>, vector<32x128xbf16>
    %cst_26 = arith.constant dense<0.000000e+00> : vector<2x128xf32>
    %47 = tpu.matmul %45, %46, %cst_26 {dimension_numbers = #tpu.dot_dimension_numbers<[1], [0], [0], [1], [0, 0, 1, 1], [], []>} : vector<2x32xbf16>, vector<32x128xbf16>, vector<2x128xf32> -> vector<2x128xf32>
    %c0_27 = arith.constant 0 : index
    %c0_28 = arith.constant 0 : index
    %48 = vector.load %arg10[%c0_27, %c0_28] : memref<1x128xf32, #tpu.memory_space<vmem>>, vector<1x128xf32>
    %49 = vector.broadcast %48 : vector<1x128xf32> to vector<2x128xf32>
    %50 = arith.addf %47, %49 : vector<2x128xf32>
    %c0_29 = arith.constant 0 : index
    %c0_30 = arith.constant 0 : index
    %51 = vector.load %arg11[%c0_29, %c0_30] : memref<32x128xbf16, #tpu.memory_space<vmem>>, vector<32x128xbf16>
    %cst_31 = arith.constant dense<0.000000e+00> : vector<2x128xf32>
    %52 = tpu.matmul %45, %51, %cst_31 {dimension_numbers = #tpu.dot_dimension_numbers<[1], [0], [0], [1], [0, 0, 1, 1], [], []>} : vector<2x32xbf16>, vector<32x128xbf16>, vector<2x128xf32> -> vector<2x128xf32>
    %c0_32 = arith.constant 0 : index
    %c0_33 = arith.constant 0 : index
    %53 = vector.load %arg12[%c0_32, %c0_33] : memref<1x128xf32, #tpu.memory_space<vmem>>, vector<1x128xf32>
    %54 = vector.broadcast %53 : vector<1x128xf32> to vector<2x128xf32>
    %55 = arith.addf %52, %54 : vector<2x128xf32>
    %56 = arith.negf %55 : vector<2x128xf32>
    %57 = math.exp %56 : vector<2x128xf32>
    %cst_34 = arith.constant 1.000000e+00 : f32
    %58 = vector.broadcast %cst_34 : f32 to vector<2x128xf32>
    %59 = arith.addf %58, %57 : vector<2x128xf32>
    %60 = arith.divf %58, %59 : vector<2x128xf32>
    %61 = arith.mulf %55, %60 : vector<2x128xf32>
    %62 = arith.mulf %50, %61 : vector<2x128xf32>
    %63 = arith.truncf %62 : vector<2x128xf32> to vector<2x128xbf16>
    %c0_35 = arith.constant 0 : index
    %c0_36 = arith.constant 0 : index
    %64 = vector.load %arg13[%c0_35, %c0_36] : memref<128x32xbf16, #tpu.memory_space<vmem>>, vector<128x32xbf16>
    %cst_37 = arith.constant dense<0.000000e+00> : vector<2x32xf32>
    %65 = tpu.matmul %63, %64, %cst_37 {dimension_numbers = #tpu.dot_dimension_numbers<[1], [0], [0], [1], [0, 0, 1, 1], [], []>} : vector<2x128xbf16>, vector<128x32xbf16>, vector<2x32xf32> -> vector<2x32xf32>
    %c0_38 = arith.constant 0 : index
    %c0_39 = arith.constant 0 : index
    %66 = vector.load %arg14[%c0_38, %c0_39] : memref<1x32xf32, #tpu.memory_space<vmem>>, vector<1x32xf32>
    %67 = vector.broadcast %66 : vector<1x32xf32> to vector<2x32xf32>
    %68 = arith.addf %65, %67 : vector<2x32xf32>
    %69 = arith.addf %44, %68 : vector<2x32xf32>
    %c0_40 = arith.constant 0 : index
    %c0_41 = arith.constant 0 : index
    %70 = vector.load %arg15[%c0_40, %c0_41] : memref<1x32xf32, #tpu.memory_space<vmem>>, vector<1x32xf32>
    %71 = arith.mulf %69, %69 : vector<2x32xf32>
    %cst_42 = arith.constant dense<0.000000e+00> : vector<2xf32>
    %72 = vector.multi_reduction <add>, %71, %cst_42 [1] : vector<2x32xf32> to vector<2xf32>
    %73 = vector.shape_cast %72 : vector<2xf32> to vector<2x1xf32>
    %74 = math.rsqrt %73 : vector<2x1xf32>
    %cst_43 = arith.constant 5.65685415 : f32
    %75 = vector.broadcast %cst_43 : f32 to vector<2x1xf32>
    %76 = arith.mulf %74, %75 : vector<2x1xf32>
    %cst_44 = arith.constant 1.000000e+08 : f32
    %77 = vector.broadcast %cst_44 : f32 to vector<2x1xf32>
    %78 = arith.minimumf %76, %77 : vector<2x1xf32>
    %79 = vector.broadcast %78 : vector<2x1xf32> to vector<2x32xf32>
    %80 = arith.mulf %69, %79 : vector<2x32xf32>
    %81 = vector.broadcast %70 : vector<1x32xf32> to vector<2x32xf32>
    %82 = arith.mulf %80, %81 : vector<2x32xf32>
    %83 = arith.truncf %82 : vector<2x32xf32> to vector<2x32xbf16>
    %c0_45 = arith.constant 0 : index
    %c0_46 = arith.constant 0 : index
    %84 = vector.load %arg16[%c0_45, %c0_46] : memref<32x128xbf16, #tpu.memory_space<vmem>>, vector<32x128xbf16>
    %cst_47 = arith.constant dense<0.000000e+00> : vector<2x128xf32>
    %85 = tpu.matmul %83, %84, %cst_47 {dimension_numbers = #tpu.dot_dimension_numbers<[1], [0], [0], [1], [0, 0, 1, 1], [], []>} : vector<2x32xbf16>, vector<32x128xbf16>, vector<2x128xf32> -> vector<2x128xf32>
    %c0_48 = arith.constant 0 : index
    %c0_49 = arith.constant 0 : index
    %86 = vector.load %arg17[%c0_48, %c0_49] : memref<1x128xf32, #tpu.memory_space<vmem>>, vector<1x128xf32>
    %87 = vector.broadcast %86 : vector<1x128xf32> to vector<2x128xf32>
    %88 = arith.addf %85, %87 : vector<2x128xf32>
    %c0_50 = arith.constant 0 : index
    %c0_51 = arith.constant 0 : index
    %89 = vector.load %arg18[%c0_50, %c0_51] : memref<2x128xf32, #tpu.memory_space<vmem>>, vector<2x128xf32>
    tpu.vector_store %arg18[%c0_50, %c0_51], %88 {strides = array<i32>} : memref<2x128xf32, #tpu.memory_space<vmem>>, vector<2x128xf32>,
    return
  }
  func.func @transform_0(%arg0: i32) -> (i32, i32) {
    %c0_i32 = arith.constant 0 : i32
    %c0_i32_0 = arith.constant 0 : i32
    return %arg0, %c0_i32 : i32, i32
  }
  func.func @transform_1(%arg0: i32) -> (i32, i32) {
    %c0_i32 = arith.constant 0 : i32
    %c0_i32_0 = arith.constant 0 : i32
    %c0_i32_1 = arith.constant 0 : i32
    return %c0_i32, %c0_i32_0 : i32, i32
  }
  func.func @transform_2(%arg0: i32) -> (i32, i32) {
    %c0_i32 = arith.constant 0 : i32
    %c0_i32_0 = arith.constant 0 : i32
    %c0_i32_1 = arith.constant 0 : i32
    return %c0_i32, %c0_i32_0 : i32, i32
  }
  func.func @transform_3(%arg0: i32) -> (i32, i32) {
    %c0_i32 = arith.constant 0 : i32
    %c0_i32_0 = arith.constant 0 : i32
    %c0_i32_1 = arith.constant 0 : i32
    return %c0_i32, %c0_i32_0 : i32, i32
  }
  func.func @transform_4(%arg0: i32) -> (i32, i32) {
    %c0_i32 = arith.constant 0 : i32
    %c0_i32_0 = arith.constant 0 : i32
    %c0_i32_1 = arith.constant 0 : i32
    return %c0_i32, %c0_i32_0 : i32, i32
  }
  func.func @transform_5(%arg0: i32) -> (i32, i32) {
    %c0_i32 = arith.constant 0 : i32
    %c0_i32_0 = arith.constant 0 : i32
    %c0_i32_1 = arith.constant 0 : i32
    return %c0_i32, %c0_i32_0 : i32, i32
  }
  func.func @transform_6(%arg0: i32) -> (i32, i32) {
    %c0_i32 = arith.constant 0 : i32
    %c0_i32_0 = arith.constant 0 : i32
    %c0_i32_1 = arith.constant 0 : i32
    return %c0_i32, %c0_i32_0 : i32, i32
  }
  func.func @transform_7(%arg0: i32) -> (i32, i32) {
    %c0_i32 = arith.constant 0 : i32
    %c0_i32_0 = arith.constant 0 : i32
    %c0_i32_1 = arith.constant 0 : i32
    return %c0_i32, %c0_i32_0 : i32, i32
  }
  func.func @transform_8(%arg0: i32) -> (i32, i32) {
    %c0_i32 = arith.constant 0 : i32
    %c0_i32_0 = arith.constant 0 : i32
    %c0_i32_1 = arith.constant 0 : i32
    return %c0_i32, %c0_i32_0 : i32, i32
  }
  func.func @transform_9(%arg0: i32) -> (i32, i32) {
    %c0_i32 = arith.constant 0 : i32
    %c0_i32_0 = arith.constant 0 : i32
    %c0_i32_1 = arith.constant 0 : i32
    return %c0_i32, %c0_i32_0 : i32, i32
  }
  func.func @transform_10(%arg0: i32) -> (i32, i32) {
    %c0_i32 = arith.constant 0 : i32
    %c0_i32_0 = arith.constant 0 : i32
    %c0_i32_1 = arith.constant 0 : i32
    return %c0_i32, %c0_i32_0 : i32, i32
  }
  func.func @transform_11(%arg0: i32) -> (i32, i32) {
    %c0_i32 = arith.constant 0 : i32
    %c0_i32_0 = arith.constant 0 : i32
    %c0_i32_1 = arith.constant 0 : i32
    return %c0_i32, %c0_i32_0 : i32, i32
  }
  func.func @transform_12(%arg0: i32) -> (i32, i32) {
    %c0_i32 = arith.constant 0 : i32
    %c0_i32_0 = arith.constant 0 : i32
    %c0_i32_1 = arith.constant 0 : i32
    return %c0_i32, %c0_i32_0 : i32, i32
  }
  func.func @transform_13(%arg0: i32) -> (i32, i32) {
    %c0_i32 = arith.constant 0 : i32
    %c0_i32_0 = arith.constant 0 : i32
    %c0_i32_1 = arith.constant 0 : i32
    return %c0_i32, %c0_i32_0 : i32, i32
  }
  func.func @transform_14(%arg0: i32) -> (i32, i32) {
    %c0_i32 = arith.constant 0 : i32
    %c0_i32_0 = arith.constant 0 : i32
    %c0_i32_1 = arith.constant 0 : i32
    return %c0_i32, %c0_i32_0 : i32, i32
  }
  func.func @transform_15(%arg0: i32) -> (i32, i32) {
    %c0_i32 = arith.constant 0 : i32
    %c0_i32_0 = arith.constant 0 : i32
    %c0_i32_1 = arith.constant 0 : i32
    return %c0_i32, %c0_i32_0 : i32, i32
  }
  func.func @transform_16(%arg0: i32) -> (i32, i32) {
    %c0_i32 = arith.constant 0 : i32
    %c0_i32_0 = arith.constant 0 : i32
    %c0_i32_1 = arith.constant 0 : i32
    return %c0_i32, %c0_i32_0 : i32, i32
  }
  func.func @transform_17(%arg0: i32) -> (i32, i32) {
    %c0_i32 = arith.constant 0 : i32
    %c0_i32_0 = arith.constant 0 : i32
    return %arg0, %c0_i32 : i32, i32
  }
}

</mosaic_0001>

<bundles_post_ra>
// kernel: tpu_custom_call.1
= control target key start
LH: loop header
LB: loop body
LE: loop exit
PB: predicated region body
PF: predicated region fallthrough
CT: control target
= control target key end

     0   :  { %s1187_s0 = inlined_call_operand.vmem [shape: bf16[16,32], index: 0, kind: input, shape index: {}]   ;;  %s1188_s1 = inlined_call_operand.vmem [shape: bf16[32,4], index: 1, kind: input, shape index: {}]   ;;  %s1189_s2 = inlined_call_operand.vmem [shape: f32[1,4], index: 2, kind: input, shape index: {}]   ;;  %s1190_s3 = inlined_call_operand.vmem [shape: bf16[32,32], index: 3, kind: input, shape index: {}]   ;;  %s1191_s4 = inlined_call_operand.vmem [shape: bf16[4,32], index: 4, kind: input, shape index: {}]   ;;  %s1192_s5 = inlined_call_operand.vmem [shape: bf16[32,32], index: 5, kind: input, shape index: {}]   ;;  %s1193_s6 = inlined_call_operand.vmem [shape: f32[1,32], index: 6, kind: input, shape index: {}]   ;;  %s1194_s7 = inlined_call_operand.vmem [shape: f32[1,32], index: 7, kind: input, shape index: {}]   ;;  %s1195_s8 = inlined_call_operand.vmem [shape: bf16[32,128], index: 8, kind: input, shape index: {}]   ;;  %s1196_s9 = inlined_call_operand.vmem [shape: f32[1,128], index: 9, kind: input, shape index: {}]   ;;  %s1197_s10 = inlined_call_operand.vmem [shape: bf16[32,128], index: 10, kind: input, shape index: {}]   ;;  %s1198_s11 = inlined_call_operand.vmem [shape: f32[1,128], index: 11, kind: input, shape index: {}]   ;;  %s1199_s12 = inlined_call_operand.vmem [shape: bf16[128,32], index: 12, kind: input, shape index: {}]   ;;  %s1200_s13 = inlined_call_operand.vmem [shape: f32[1,32], index: 13, kind: input, shape index: {}]   ;;  %s1201_s14 = inlined_call_operand.vmem [shape: f32[1,32], index: 14, kind: input, shape index: {}]   ;;  %s1202_s15 = inlined_call_operand.vmem [shape: bf16[32,128], index: 15, kind: input, shape index: {}]   ;;  %s1203_s16 = inlined_call_operand.vmem [shape: f32[1,128], index: 16, kind: input, shape index: {}]   ;;  %s1204_s17 = inlined_call_operand.hbm [shape: f32[2,128], index: 17, kind: output, shape index: {}]  }
   0x1   :  { %1206 = sst [smem:[#allocation5_spill]] %s1187_s0 }
   0x2   :  { %1207 = sst [smem:[#allocation6_spill]] %s1188_s1 }
   0x3   :  { %s1208_s26 = sld [smem:[#allocation6_spill]]  ;;  %v940_v1 = vmov 0.0   ;;  %vm941_vm0 = vmmov 0   ;;  %s1209_s30 = sld [smem:[#allocation5_spill]]  ;;  %vm88_vm1 = vcmask 261120  }
   0x4   :  { %802 = vmatprep.subr.bf16.mxu1 %v940_v1  ;;  %818 = vmatprep.subr.bf16.mxu0 %v940_v1 }
   0x5   :  { %806 = vmatprep.mubr.msk.bf16.mxu1 %vm941_vm0, %v940_v1  ;;  %820 = vmatprep.mubr.msk.bf16.mxu0 %vm941_vm0, %v940_v1 }
   0x9   :  { %v879_v0 = vld [vmem:[%s1208_s26] sm:$0xff]   ;;  %v880_v2 = vld [vmem:[%s1208_s26 + $0x8] sm:$0xff]  }
   0xa   :  { %803 = vmatpush3.bf16.msra.mxu1 %v879_v0  ;;  %v881_v3 = vld [vmem:[%s1209_s30] sm:$0xff]  }
   0xb   :  { %804 = vmatprep.subr.bf16.mxu1 %v940_v1 }
   0xe   :  { %805 = vmatpush3.bf16.msra.mxu1 %v880_v2 }
   0xf   :  { %810 = vmatprep.subr.bf16.mxu1 %v940_v1 }
  0x11   :  { %807 = vmatmul.mubr.msk.bf16.vlgmr.msra.gmra.mrb[0].mxu1 %vm88_vm1, %v881_v3 }
  0x12   :  { %814 = vmatprep.mubr.msk.bf16.mxu1 %vm941_vm0, %v940_v1 }
  0x13   :  { %22 = vsyncpa [#allocation3], 0  ;;  %v882_v4 = vld [vmem:[%s1190_s3] sm:$0xff]   ;;  %vm234_vm2 = vcmask 1041408   ;;  %v883_v7 = vld [vmem:[%s1190_s3 + $0x8] sm:$0xff]   ;;  %vm133_vm3 = vcmask 31744  }
  0x14   :  { %v230_v5 = vld [vmem:[%s1191_s4] sm:$0x3]  ;;  %811 = vmatpush3.bf16.msra.mxu1 %v882_v4  ;;  %v885_v59 = vld [vmem:[%s1192_s5 + $0x8] sm:$0xff]   ;;  %vm312_vm4 = vcmask 1041409   ;;  %vm372_vm5 = vcmask 254976  }
  0x15   :  { %v236_v6 = vsel %vm234_vm2, %v230_v5, 0  ;;  %812 = vmatprep.subr.bf16.mxu1 %v940_v1  ;;  %v736_v8 = vld [vmem:[%s1189_s2] ss:$0 sm:$0xff] }
  0x16   :  { %819 = vmatpush3.bf16.msra.mxu0 %v236_v6  ;;  %v884_v58 = vld [vmem:[%s1192_s5] sm:$0xff]  }
  0x17   :  { %832 = vmatprep.subr.bf16.mxu0 %v940_v1 }
  0x18   :  { %813 = vmatpush3.bf16.msra.mxu1 %v883_v7 }
  0x19   :  { %824 = vmatprep.subr.bf16.mxu1 %v940_v1 }
  0x1b   :  { %815 = vmatmul.mubr.msk.bf16.vlgmr.msra.gmra.mrb[4].mxu1 %vm88_vm1, %v881_v3 }
  0x1c   :  { %828 = vmatprep.mubr.msk.bf16.mxu1 %vm941_vm0, %v940_v1  ;;  %825 = vmatpush3.bf16.msra.mxu1 %v884_v58 }
  0x1d   :  { %826 = vmatprep.subr.bf16.mxu1 %v940_v1 }
  0x20   :  { %827 = vmatpush3.bf16.msra.mxu1 %v885_v59 }
  0x21   :  { %840 = vmatprep.subr.bf16.mxu1 %v940_v1 }
  0xe4   :  { %v126_v9 = vpop.f32.mrb[0].mxu1 }
  0xe5   :  { %v127_v10 = vadd.f32 %v736_v8, %v126_v9  ;;  %v808_v11 = vpop.f32.mrb[1].mxu1 }
  0xe6   :  { %v129_v12 = vpop.f32.mrb[2].mxu1 }
  0xe7   :  { %v134_v13 = vsel %vm133_vm3, %v127_v10, -inf  ;;  %v130_v14 = vadd.f32 %v736_v8, %v129_v12  ;;  %v809_v15 = vpop.f32.mrb[3].mxu1 }
  0xe8   :  { %v135_v16 = vrot.slane %v134_v13, 4 }
  0xe9   :  { %v141_v17 = vsel %vm133_vm3, %v130_v14, -inf }
  0xea   :  { %v136_v18 = vmax.f32 %v134_v13, %v135_v16  ;;  %v142_v19 = vrot.slane %v141_v17, 4 }
  0xec   :  { %v137_v20 = vrot.slane %v136_v18, 2  ;;  %v143_v21 = vmax.f32 %v141_v17, %v142_v19 }
  0xee   :  { %v138_v22 = vmax.f32 %v136_v18, %v137_v20  ;;  %v144_v23 = vrot.slane %v143_v21, 2  ;;  %v222_v54 = vpop.f32.mrb[4].mxu1 }
  0xef   :  { %v816_v55 = vpop.f32.mrb[5].mxu1 }
  0xf0   :  { %v139_v24 = vrot.slane %v138_v22, 1  ;;  %v145_v25 = vmax.f32 %v143_v21, %v144_v23  ;;  %v225_v56 = vpop.f32.mrb[6].mxu1  ;;  %v745_v23 = vld [vmem:[%s1193_s6] ss:$0 sm:$0xff] }
  0xf1   :  { %v817_v57 = vpop.f32.mrb[7].mxu1 }
  0xf2   :  { %v140_v26 = vmax.f32 %v138_v22, %v139_v24  ;;  %v146_v27 = vrot.slane %v145_v25, 1 }
  0xf4   :  { %v148_v28 = vsub.f32 %v127_v10, %v140_v26  ;;  %v147_v29 = vmax.f32 %v145_v25, %v146_v27 }
  0xf6   :  { %v150_v30 = vmul.f32 1.442695, %v148_v28  ;;  %v149_v31 = vsub.f32 %v130_v14, %v147_v29 }
  0xf8   :  { %900 = vpow2.f32 %v150_v30  ;;  %v152_v32 = vmul.f32 1.442695, %v149_v31  ;;  %v886_v31 = vld [vmem:[%s1197_s10] sm:$0xff]  }
  0xfa   :  { %902 = vpow2.f32 %v152_v32  ;;  %v887_v32 = vld [vmem:[%s1195_s8] sm:$0xff]  }
 0x102   :  { %v901_v33 = vpop.eup %900 }
 0x103   :  { %v154_v34 = vsel %vm133_vm3, %v901_v33, 0.0 }
 0x104   :  { %v903_v35 = vpop.eup %902  ;;  %v155_v36 = vrot.slane %v154_v34, 4 }
 0x105   :  { %v161_v37 = vsel %vm133_vm3, %v903_v35, 0.0 }
 0x106   :  { %v156_v38 = vadd.f32 %v155_v36, %v154_v34  ;;  %v162_v39 = vrot.slane %v161_v37, 4  ;;  %v889_v34 = vld [vmem:[%s1195_s8 + $0x8] sm:$0xff]  }
 0x108   :  { %v157_v40 = vrot.slane %v156_v38, 2  ;;  %v163_v41 = vadd.f32 %v162_v39, %v161_v37  ;;  %v749_v39 = vld [vmem:[%s1194_s7] ss:$0 sm:$0xff] }
 0x10a   :  { %v158_v42 = vadd.f32 %v157_v40, %v156_v38  ;;  %v164_v43 = vrot.slane %v163_v41, 2 }
 0x10c   :  { %v159_v44 = vrot.slane %v158_v42, 1  ;;  %v165_v45 = vadd.f32 %v164_v43, %v163_v41  ;;  %v890_v43 = vld [vmem:[%s1199_s12] sm:$0xff]  }
 0x10e   :  { %v160_v46 = vadd.f32 %v159_v44, %v158_v42  ;;  %v166_v47 = vrot.slane %v165_v45, 1  ;;  %v891_v44 = vld [vmem:[%s1199_s12 + $0x8] sm:$0xff]  }
 0x110   :  { %904 = vrcp.f32 %v160_v46  ;;  %v167_v48 = vadd.f32 %v166_v47, %v165_v45  ;;  %v892_v45 = vld [vmem:[%s1199_s12 + $0x10] sm:$0xff]   ;;  %v893_v46 = vld [vmem:[%s1199_s12 + $0x18] sm:$0xff]   ;;  %v894_v47 = vld [vmem:[%s1199_s12 + $0x20] sm:$0xff]  }
 0x112   :  { %906 = vrcp.f32 %v167_v48  ;;  %v895_v48 = vld [vmem:[%s1199_s12 + $0x28] sm:$0xff]  }
 0x11a   :  { %v905_v49 = vpop.eup %904 }
 0x11b   :  { %v170_v51 = vmul.f32 %v905_v49, %v901_v33  ;;  %v888_v33 = vld [vmem:[%s1197_s10 + $0x8] sm:$0xff]   ;;  %v896_v49 = vld [vmem:[%s1199_s12 + $0x30] sm:$0xff]  }
 0x11c   :  { %v907_v50 = vpop.eup %906 }
 0x11d   :  { %v171_v52 = vmul.f32 %v907_v50, %v903_v35  ;;  %v897_v50 = vld [vmem:[%s1199_s12 + $0x38] sm:$0xff]  }
 0x11f   :  { %v229_v53 = vpack.c.bf16 %v171_v52, %v170_v51  ;;  %v754_v51 = vld [vmem:[%s1198_s11] ss:$0 sm:$0xff] }
 0x121   :  { %821 = vmatmul.mubr.msk.bf16.vlgmr.msra.gmra.mrb[0].mxu0 %vm133_vm3, %v229_v53 }
 0x122   :  { %836 = vmatprep.mubr.msk.bf16.mxu0 %vm941_vm0, %v940_v1  ;;  %833 = vmatpush3.bf16.msra.mxu0 %v887_v32 }
 0x123   :  { %834 = vmatprep.subr.bf16.mxu0 %v940_v1 }
 0x126   :  { %835 = vmatpush3.bf16.msra.mxu0 %v889_v34 }
 0x127   :  { %848 = vmatprep.subr.bf16.mxu0 %v940_v1 }
 0x1f4   :  { %v272_v60 = vpop.f32.mrb[0].mxu0 }
 0x1f5   :  { %v279_v61 = vmul.f32 %v272_v60, %v222_v54  ;;  %v822_v62 = vpop.f32.mrb[1].mxu0 }
 0x1f6   :  { %v275_v63 = vpop.f32.mrb[2].mxu0 }
 0x1f7   :  { %v281_v0 = vsel %vm88_vm1, %v279_v61, 0.0  ;;  %v280_v2 = vmul.f32 %v275_v63, %v225_v56  ;;  %v823_v3 = vpop.f32.mrb[3].mxu0 }
 0x1f8   :  { %v282_v4 = vrot.slane %v281_v0, 4 }
 0x1f9   :  { %v288_v5 = vsel %vm88_vm1, %v280_v2, 0.0 }
 0x1fa   :  { %v283_v6 = vadd.f32 %v282_v4, %v281_v0  ;;  %v289_v7 = vrot.slane %v288_v5, 4  ;;  %v750_v0 = vld [vmem:[%s1196_s9] ss:$0 sm:$0xff] }
 0x1fc   :  { %v284_v8 = vrot.slane %v283_v6, 2  ;;  %v290_v9 = vadd.f32 %v289_v7, %v288_v5  ;;  %v759_v7 = vld [vmem:[%s1200_s13] ss:$0 sm:$0xff] }
 0x1fe   :  { %v285_v10 = vadd.f32 %v284_v8, %v283_v6  ;;  %v291_v11 = vrot.slane %v290_v9, 2 }
 0x200   :  { %v286_v12 = vrot.slane %v285_v10, 1  ;;  %v292_v13 = vadd.f32 %v291_v11, %v290_v9 }
 0x202   :  { %v287_v14 = vadd.f32 %v286_v12, %v285_v10  ;;  %v293_v15 = vrot.slane %v292_v13, 1 }
 0x204   :  { %v295_v16 = vpack.c.bf16 %v287_v14, %v287_v14  ;;  %v294_v17 = vadd.f32 %v293_v15, %v292_v13 }
 0x206   :  { %v296_v18 = vpack.c.bf16 %v294_v17, %v294_v17  ;;  %v310_v19 = vunpack.c.l.b16 %v295_v16  ;;  %v898_v16 = vld [vmem:[%s1202_s15] sm:$0xff]   ;;  %v899_v17 = vld [vmem:[%s1202_s15 + $0x8] sm:$0xff]   ;;  %s942_s15 = smov [#allocation2]  }
 0x207   :  { %s728_s21 = sshll.u32 %s942_s15, 4  ;;  %s729_s21 = int_to_ptr.vmem [resolvable:$true] %s728_s21 }
 0x208   :  { %v311_v20 = vunpack.c.l.b16 %v296_v18  ;;  %s916_s22 = scalar_lea.vmem %s729_s21, 32  ;;  %p921_p1 = scmp.lt.s32.totalorder %s729_s21, %s729_s21 }
 0x209   :  { %p917_p0 = scmp.ne.s32.totalorder %s729_s21, %s916_s22  ;;  %p922_p2 = scmp.lt.s32.totalorder %s916_s22, %s916_s22 }
 0x20a   :  { %v313_v21 = vsel %vm312_vm4, %v311_v20, %v310_v19 }
 0x20b   :  { %v314_v22 = vpack.c.b16 %v313_v21, %v313_v21  ;;  %p923_p3 = por %p922_p2, %p921_p1 }
 0x20d   :  { %829 = vmatmul.mubr.msk.bf16.vlgmr.msra.gmra.mrb[8].mxu1 %vm88_vm1, %v314_v22  ;;  %v768_v22 = vld [vmem:[%s1201_s14] ss:$0 sm:$0xff]  ;;  %p924_p4 = pnand %p923_p3, %p917_p0 }
 0x20e   :  { %844 = vmatprep.mubr.msk.bf16.mxu1 %vm941_vm0, %v940_v1  ;;  %841 = vmatpush3.bf16.msra.mxu1 %v886_v31 }
 0x20f   :  { %842 = vmatprep.subr.bf16.mxu1 %v940_v1 }
 0x212   :  { %843 = vmatpush3.bf16.msra.mxu1 %v888_v33 }
 0x213   :  { %868 = vmatprep.subr.bf16.mxu1 %v940_v1 }
 0x2e0   :  { %v364_v24 = vpop.f32.mrb[8].mxu1 }
 0x2e1   :  { %v365_v25 = vadd.f32 %v745_v23, %v364_v24  ;;  %v830_v26 = vpop.f32.mrb[9].mxu1 }
 0x2e2   :  { %v367_v27 = vpop.f32.mrb[10].mxu1 }
 0x2e3   :  { %v831_v28 = vpop.f32.mrb[11].mxu1  ;;  %v371_v29 = vmul.f32 %v365_v25, %v365_v25 }
 0x2e5   :  { %v373_v30 = vsel %vm372_vm5, %v371_v29, 0.0 }
 0x2e6   :  { %374 = vadd.xlane.f32.xlu0 %v373_v30 }
 0x373   :  { %v375_v35 = vpop.xlane.xlu0 %374 }
 0x374   :  { %908 = vrsqrt.f32 %v375_v35 }
 0x37e   :  { %v909_v36 = vpop.eup %908 }
 0x37f   :  { %v377_v37 = vmul.f32 5.656854, %v909_v36 }
 0x381   :  { %v378_v38 = vmin.f32 %v377_v37, 1e+08 }
 0x383   :  { %v379_v40 = vmul.f32 %v378_v38, %v365_v25 }
 0x385   :  { %v386_v41 = vmul.f32 %v749_v39, %v379_v40 }
 0x387   :  { %v387_v42 = vpack.c.bf16 %v386_v41, %v386_v41 }
 0x389   :  { %837 = vmatmul.mubr.msk.bf16.vlgmr.msra.gmra.mrb[4].mxu0 %vm88_vm1, %v387_v42  ;;  %845 = vmatmul.mubr.msk.bf16.vlgmr.msra.gmra.mrb[12].mxu1 %vm88_vm1, %v387_v42 }
 0x38a   :  { %864 = vmatprep.mubr.msk.bf16.mxu0 %vm941_vm0, %v940_v1  ;;  %872 = vmatprep.mubr.msk.bf16.mxu1 %vm941_vm0, %v940_v1 }
 0x38b   :  { %849 = vmatpush3.bf16.msra.mxu0 %v890_v43  ;;  %869 = vmatpush3.bf16.msra.mxu1 %v898_v16 }
 0x38c   :  { %850 = vmatprep.subr.bf16.mxu0 %v940_v1  ;;  %870 = vmatprep.subr.bf16.mxu1 %v940_v1 }
 0x38f   :  { %851 = vmatpush3.bf16.msra.mxu0 %v891_v44  ;;  %871 = vmatpush3.bf16.msra.mxu1 %v899_v17 }
 0x390   :  { %852 = vmatprep.subr.bf16.mxu0 %v940_v1 }
 0x393   :  { %853 = vmatpush3.bf16.msra.mxu0 %v892_v45 }
 0x394   :  { %854 = vmatprep.subr.bf16.mxu0 %v940_v1 }
 0x397   :  { %855 = vmatpush3.bf16.msra.mxu0 %v893_v46 }
 0x398   :  { %856 = vmatprep.subr.bf16.mxu0 %v940_v1 }
 0x39b   :  { %857 = vmatpush3.bf16.msra.mxu0 %v894_v47 }
 0x39c   :  { %858 = vmatprep.subr.bf16.mxu0 %v940_v1 }
 0x39f   :  { %859 = vmatpush3.bf16.msra.mxu0 %v895_v48 }
 0x3a0   :  { %860 = vmatprep.subr.bf16.mxu0 %v940_v1 }
 0x3a3   :  { %861 = vmatpush3.bf16.msra.mxu0 %v896_v49 }
 0x3a4   :  { %862 = vmatprep.subr.bf16.mxu0 %v940_v1  ;;  %v769_v1 = vld [vmem:[%s1203_s16] ss:$0 sm:$0xff] }
 0x3a7   :  { %863 = vmatpush3.bf16.msra.mxu0 %v897_v50 }
 0x45c   :  { %v448_v52 = vpop.f32.mrb[4].mxu0  ;;  %v511_v53 = vpop.f32.mrb[12].mxu1 }
 0x45d   :  { %v512_v54 = vadd.f32 %v754_v51, %v511_v53  ;;  %v838_v55 = vpop.f32.mrb[5].mxu0  ;;  %v846_v56 = vpop.f32.mrb[13].mxu1  ;;  %v449_v3 = vadd.f32 %v750_v0, %v448_v52 }
 0x45e   :  { %v451_v57 = vpop.f32.mrb[6].mxu0  ;;  %v514_v58 = vpop.f32.mrb[14].mxu1 }
 0x45f   :  { %v758_v59 = vmul.f32 -1.442695, %v512_v54  ;;  %v839_v60 = vpop.f32.mrb[7].mxu0  ;;  %v847_v61 = vpop.f32.mrb[15].mxu1 }
 0x461   :  { %910 = vpow2.f32 %v758_v59 }
 0x46b   :  { %v911_v62 = vpop.eup %910 }
 0x46c   :  { %v520_v63 = vadd.f32 1.0, %v911_v62 }
 0x46e   :  { %912 = vrcp.f32 %v520_v63 }
 0x478   :  { %v913_v2 = vpop.eup %912 }
 0x479   :  { %v523_v4 = vmul.f32 %v913_v2, %v512_v54 }
 0x47b   :  { %v524_v5 = vmul.f32 %v523_v4, %v449_v3 }
 0x47d   :  { %v525_v6 = vpack.c.bf16 %v524_v5, %v524_v5 }
 0x47f   :  { %865 = vmatmul.mubr.bf16.vlgmr.msra.gmra.mrb[8].mxu0 %v525_v6 }
 0x552   :  { %v631_v8 = vpop.f32.mrb[8].mxu0 }
 0x553   :  { %v632_v9 = vadd.f32 %v759_v7, %v631_v8  ;;  %v866_v10 = vpop.f32.mrb[9].mxu0 }
 0x554   :  { %v634_v11 = vpop.f32.mrb[10].mxu0 }
 0x555   :  { %v637_v12 = vadd.f32 %v632_v9, %v386_v41  ;;  %v867_v13 = vpop.f32.mrb[11].mxu0 }
 0x557   :  { %v639_v14 = vmul.f32 %v637_v12, %v637_v12 }
 0x559   :  { %v640_v15 = vsel %vm372_vm5, %v639_v14, 0.0 }
 0x55a   :  { %641 = vadd.xlane.f32.xlu0 %v640_v15 }
 0x5e7   :  { %v642_v18 = vpop.xlane.xlu0 %641 }
 0x5e8   :  { %914 = vrsqrt.f32 %v642_v18 }
 0x5f2   :  { %v915_v19 = vpop.eup %914 }
 0x5f3   :  { %v644_v20 = vmul.f32 5.656854, %v915_v19 }
 0x5f5   :  { %v645_v21 = vmin.f32 %v644_v20, 1e+08 }
 0x5f7   :  { %v646_v23 = vmul.f32 %v645_v21, %v637_v12 }
 0x5f9   :  { %v653_v24 = vmul.f32 %v768_v22, %v646_v23 }
 0x5fb   :  { %v654_v25 = vpack.c.bf16 %v653_v24, %v653_v24 }
 0x5fd   :  { %873 = vmatmul.mubr.msk.bf16.vlgmr.msra.gmra.mrb[16].mxu1 %vm88_vm1, %v654_v25 }
 0x6d0   :  { %v715_v26 = vpop.f32.mrb[16].mxu1 }
 0x6d1   :  { %v716_v27 = vadd.f32 %v769_v1, %v715_v26  ;;  %v874_v28 = vpop.f32.mrb[17].mxu1 }
 0x6d2   :  { %v718_v29 = vpop.f32.mrb[18].mxu1 }
 0x6d3   :  { %721 = vst [vmem:[#allocation2] sm:$0x3] %v716_v27  ;;  %v875_v30 = vpop.f32.mrb[19].mxu1 }
 0x6d4   :  { %927 = shalt.err (!%p924_p4)
}
 0x6d5   :  { %s928_s16 = scalar_lea.hbm %s1204_s17, 32 }
 0x6d6   :  { %p929_p5 = scmp.ne.s32.totalorder %s1204_s17, %s928_s16  ;;  %p932_p6 = scmp.lt.u32.totalorder %s928_s16, %s1204_s17 }
 0x6d8   :  { %p934_p7 = pnand %p932_p6, %p929_p5 }
 0x6da   :  { %937 = shalt.err (!%p934_p7)
}
 0x6db   :  { %731 = dma.vmem_to_hbm [thread:$0]  %s729_s21, 32, %s1204_s17, [#allocation3]  }
 0x6dc   :  { %938 = dma.done.wait [#allocation3], 32  }
 0x6dd   :  { %939 = vsyncadd [#allocation3], 4294967264 }
 0x6de   :  { %735 = vsyncpa [#allocation3], 1 }

// kernel: tpu_custom_call.1
= control target key start
LH: loop header
LB: loop body
LE: loop exit
PB: predicated region body
PF: predicated region fallthrough
CT: control target
= control target key end

     0   :  { %s1187_s0 = inlined_call_operand.vmem [shape: bf16[16,32], index: 0, kind: input, shape index: {}]   ;;  %s1188_s1 = inlined_call_operand.vmem [shape: bf16[32,4], index: 1, kind: input, shape index: {}]   ;;  %s1189_s2 = inlined_call_operand.vmem [shape: f32[1,4], index: 2, kind: input, shape index: {}]   ;;  %s1190_s3 = inlined_call_operand.vmem [shape: bf16[32,32], index: 3, kind: input, shape index: {}]   ;;  %s1191_s4 = inlined_call_operand.vmem [shape: bf16[4,32], index: 4, kind: input, shape index: {}]   ;;  %s1192_s5 = inlined_call_operand.vmem [shape: bf16[32,32], index: 5, kind: input, shape index: {}]   ;;  %s1193_s6 = inlined_call_operand.vmem [shape: f32[1,32], index: 6, kind: input, shape index: {}]   ;;  %s1194_s7 = inlined_call_operand.vmem [shape: f32[1,32], index: 7, kind: input, shape index: {}]   ;;  %s1195_s8 = inlined_call_operand.vmem [shape: bf16[32,128], index: 8, kind: input, shape index: {}]   ;;  %s1196_s9 = inlined_call_operand.vmem [shape: f32[1,128], index: 9, kind: input, shape index: {}]   ;;  %s1197_s10 = inlined_call_operand.vmem [shape: bf16[32,128], index: 10, kind: input, shape index: {}]   ;;  %s1198_s11 = inlined_call_operand.vmem [shape: f32[1,128], index: 11, kind: input, shape index: {}]   ;;  %s1199_s12 = inlined_call_operand.vmem [shape: bf16[128,32], index: 12, kind: input, shape index: {}]   ;;  %s1200_s13 = inlined_call_operand.vmem [shape: f32[1,32], index: 13, kind: input, shape index: {}]   ;;  %s1201_s14 = inlined_call_operand.vmem [shape: f32[1,32], index: 14, kind: input, shape index: {}]   ;;  %s1202_s15 = inlined_call_operand.vmem [shape: bf16[32,128], index: 15, kind: input, shape index: {}]   ;;  %s1203_s16 = inlined_call_operand.vmem [shape: f32[1,128], index: 16, kind: input, shape index: {}]   ;;  %s1204_s17 = inlined_call_operand.hbm [shape: f32[2,128], index: 17, kind: output, shape index: {}]  }
   0x1   :  { %1206 = sst [smem:[#allocation5_spill]] %s1187_s0 }
   0x2   :  { %1207 = sst [smem:[#allocation6_spill]] %s1188_s1 }
   0x3   :  { %s1208_s26 = sld [smem:[#allocation6_spill]]  ;;  %v940_v1 = vmov 0.0   ;;  %vm941_vm0 = vmmov 0   ;;  %s1209_s30 = sld [smem:[#allocation5_spill]]  ;;  %vm88_vm1 = vcmask 261120  }
   0x4   :  { %802 = vmatprep.subr.bf16.mxu1 %v940_v1  ;;  %818 = vmatprep.subr.bf16.mxu0 %v940_v1 }
   0x5   :  { %806 = vmatprep.mubr.msk.bf16.mxu1 %vm941_vm0, %v940_v1  ;;  %820 = vmatprep.mubr.msk.bf16.mxu0 %vm941_vm0, %v940_v1 }
   0x9   :  { %v879_v0 = vld [vmem:[%s1208_s26] sm:$0xff]   ;;  %v880_v2 = vld [vmem:[%s1208_s26 + $0x8] sm:$0xff]  }
   0xa   :  { %803 = vmatpush3.bf16.msra.mxu1 %v879_v0  ;;  %v881_v3 = vld [vmem:[%s1209_s30] sm:$0xff]  }
   0xb   :  { %804 = vmatprep.subr.bf16.mxu1 %v940_v1 }
   0xe   :  { %805 = vmatpush3.bf16.msra.mxu1 %v880_v2 }
   0xf   :  { %810 = vmatprep.subr.bf16.mxu1 %v940_v1 }
  0x11   :  { %807 = vmatmul.mubr.msk.bf16.vlgmr.msra.gmra.mrb[0].mxu1 %vm88_vm1, %v881_v3 }
  0x12   :  { %814 = vmatprep.mubr.msk.bf16.mxu1 %vm941_vm0, %v940_v1 }
  0x13   :  { %22 = vsyncpa [#allocation3], 0  ;;  %v882_v4 = vld [vmem:[%s1190_s3] sm:$0xff]   ;;  %vm234_vm2 = vcmask 1041408   ;;  %v883_v7 = vld [vmem:[%s1190_s3 + $0x8] sm:$0xff]   ;;  %vm133_vm3 = vcmask 31744  }
  0x14   :  { %v230_v5 = vld [vmem:[%s1191_s4] sm:$0x3]  ;;  %811 = vmatpush3.bf16.msra.mxu1 %v882_v4  ;;  %v885_v59 = vld [vmem:[%s1192_s5 + $0x8] sm:$0xff]   ;;  %vm312_vm4 = vcmask 1041409   ;;  %vm372_vm5 = vcmask 254976  }
  0x15   :  { %v236_v6 = vsel %vm234_vm2, %v230_v5, 0  ;;  %812 = vmatprep.subr.bf16.mxu1 %v940_v1  ;;  %v736_v8 = vld [vmem:[%s1189_s2] ss:$0 sm:$0xff] }
  0x16   :  { %819 = vmatpush3.bf16.msra.mxu0 %v236_v6  ;;  %v884_v58 = vld [vmem:[%s1192_s5] sm:$0xff]  }
  0x17   :  { %832 = vmatprep.subr.bf16.mxu0 %v940_v1 }
  0x18   :  { %813 = vmatpush3.bf16.msra.mxu1 %v883_v7 }
  0x19   :  { %824 = vmatprep.subr.bf16.mxu1 %v940_v1 }
  0x1b   :  { %815 = vmatmul.mubr.msk.bf16.vlgmr.msra.gmra.mrb[4].mxu1 %vm88_vm1, %v881_v3 }
  0x1c   :  { %828 = vmatprep.mubr.msk.bf16.mxu1 %vm941_vm0, %v940_v1  ;;  %825 = vmatpush3.bf16.msra.mxu1 %v884_v58 }
  0x1d   :  { %826 = vmatprep.subr.bf16.mxu1 %v940_v1 }
  0x20   :  { %827 = vmatpush3.bf16.msra.mxu1 %v885_v59 }
  0x21   :  { %840 = vmatprep.subr.bf16.mxu1 %v940_v1 }
  0xe4   :  { %v126_v9 = vpop.f32.mrb[0].mxu1 }
  0xe5   :  { %v127_v10 = vadd.f32 %v736_v8, %v126_v9  ;;  %v808_v11 = vpop.f32.mrb[1].mxu1 }
  0xe6   :  { %v129_v12 = vpop.f32.mrb[2].mxu1 }
  0xe7   :  { %v134_v13 = vsel %vm133_vm3, %v127_v10, -inf  ;;  %v130_v14 = vadd.f32 %v736_v8, %v129_v12  ;;  %v809_v15 = vpop.f32.mrb[3].mxu1 }
  0xe8   :  { %v135_v16 = vrot.slane %v134_v13, 4 }
  0xe9   :  { %v141_v17 = vsel %vm133_vm3, %v130_v14, -inf }
  0xea   :  { %v136_v18 = vmax.f32 %v134_v13, %v135_v16  ;;  %v142_v19 = vrot.slane %v141_v17, 4 }
  0xec   :  { %v137_v20 = vrot.slane %v136_v18, 2  ;;  %v143_v21 = vmax.f32 %v141_v17, %v142_v19 }
  0xee   :  { %v138_v22 = vmax.f32 %v136_v18, %v137_v20  ;;  %v144_v23 = vrot.slane %v143_v21, 2  ;;  %v222_v54 = vpop.f32.mrb[4].mxu1 }
  0xef   :  { %v816_v55 = vpop.f32.mrb[5].mxu1 }
  0xf0   :  { %v139_v24 = vrot.slane %v138_v22, 1  ;;  %v145_v25 = vmax.f32 %v143_v21, %v144_v23  ;;  %v225_v56 = vpop.f32.mrb[6].mxu1  ;;  %v745_v23 = vld [vmem:[%s1193_s6] ss:$0 sm:$0xff] }
  0xf1   :  { %v817_v57 = vpop.f32.mrb[7].mxu1 }
  0xf2   :  { %v140_v26 = vmax.f32 %v138_v22, %v139_v24  ;;  %v146_v27 = vrot.slane %v145_v25, 1 }
  0xf4   :  { %v148_v28 = vsub.f32 %v127_v10, %v140_v26  ;;  %v147_v29 = vmax.f32 %v145_v25, %v146_v27 }
  0xf6   :  { %v150_v30 = vmul.f32 1.442695, %v148_v28  ;;  %v149_v31 = vsub.f32 %v130_v14, %v147_v29 }
  0xf8   :  { %900 = vpow2.f32 %v150_v30  ;;  %v152_v32 = vmul.f32 1.442695, %v149_v31  ;;  %v886_v31 = vld [vmem:[%s1197_s10] sm:$0xff]  }
  0xfa   :  { %902 = vpow2.f32 %v152_v32  ;;  %v887_v32 = vld [vmem:[%s1195_s8] sm:$0xff]  }
 0x102   :  { %v901_v33 = vpop.eup %900 }
 0x103   :  { %v154_v34 = vsel %vm133_vm3, %v901_v33, 0.0 }
 0x104   :  { %v903_v35 = vpop.eup %902  ;;  %v155_v36 = vrot.slane %v154_v34, 4 }
 0x105   :  { %v161_v37 = vsel %vm133_vm3, %v903_v35, 0.0 }
 0x106   :  { %v156_v38 = vadd.f32 %v155_v36, %v154_v34  ;;  %v162_v39 = vrot.slane %v161_v37, 4  ;;  %v889_v34 = vld [vmem:[%s1195_s8 + $0x8] sm:$0xff]  }
 0x108   :  { %v157_v40 = vrot.slane %v156_v38, 2  ;;  %v163_v41 = vadd.f32 %v162_v39, %v161_v37  ;;  %v749_v39 = vld [vmem:[%s1194_s7] ss:$0 sm:$0xff] }
 0x10a   :  { %v158_v42 = vadd.f32 %v157_v40, %v156_v38  ;;  %v164_v43 = vrot.slane %v163_v41, 2 }
 0x10c   :  { %v159_v44 = vrot.slane %v158_v42, 1  ;;  %v165_v45 = vadd.f32 %v164_v43, %v163_v41  ;;  %v890_v43 = vld [vmem:[%s1199_s12] sm:$0xff]  }
 0x10e   :  { %v160_v46 = vadd.f32 %v159_v44, %v158_v42  ;;  %v166_v47 = vrot.slane %v165_v45, 1  ;;  %v891_v44 = vld [vmem:[%s1199_s12 + $0x8] sm:$0xff]  }
 0x110   :  { %904 = vrcp.f32 %v160_v46  ;;  %v167_v48 = vadd.f32 %v166_v47, %v165_v45  ;;  %v892_v45 = vld [vmem:[%s1199_s12 + $0x10] sm:$0xff]   ;;  %v893_v46 = vld [vmem:[%s1199_s12 + $0x18] sm:$0xff]   ;;  %v894_v47 = vld [vmem:[%s1199_s12 + $0x20] sm:$0xff]  }
 0x112   :  { %906 = vrcp.f32 %v167_v48  ;;  %v895_v48 = vld [vmem:[%s1199_s12 + $0x28] sm:$0xff]  }
 0x11a   :  { %v905_v49 = vpop.eup %904 }
 0x11b   :  { %v170_v51 = vmul.f32 %v905_v49, %v901_v33  ;;  %v888_v33 = vld [vmem:[%s1197_s10 + $0x8] sm:$0xff]   ;;  %v896_v49 = vld [vmem:[%s1199_s12 + $0x30] sm:$0xff]  }
 0x11c   :  { %v907_v50 = vpop.eup %906 }
 0x11d   :  { %v171_v52 = vmul.f32 %v907_v50, %v903_v35  ;;  %v897_v50 = vld [vmem:[%s1199_s12 + $0x38] sm:$0xff]  }
 0x11f   :  { %v229_v53 = vpack.c.bf16 %v171_v52, %v170_v51  ;;  %v754_v51 = vld [vmem:[%s1198_s11] ss:$0 sm:$0xff] }
 0x121   :  { %821 = vmatmul.mubr.msk.bf16.vlgmr.msra.gmra.mrb[0].mxu0 %vm133_vm3, %v229_v53 }
 0x122   :  { %836 = vmatprep.mubr.msk.bf16.mxu0 %vm941_vm0, %v940_v1  ;;  %833 = vmatpush3.bf16.msra.mxu0 %v887_v32 }
 0x123   :  { %834 = vmatprep.subr.bf16.mxu0 %v940_v1 }
 0x126   :  { %835 = vmatpush3.bf16.msra.mxu0 %v889_v34 }
 0x127   :  { %848 = vmatprep.subr.bf16.mxu0 %v940_v1 }
 0x1f4   :  { %v272_v60 = vpop.f32.mrb[0].mxu0 }
 0x1f5   :  { %v279_v61 = vmul.f32 %v272_v60, %v222_v54  ;;  %v822_v62 = vpop.f32.mrb[1].mxu0 }
 0x1f6   :  { %v275_v63 = vpop.f32.mrb[2].mxu0 }
 0x1f7   :  { %v281_v0 = vsel %vm88_vm1, %v279_v61, 0.0  ;;  %v280_v2 = vmul.f32 %v275_v63, %v225_v56  ;;  %v823_v3 = vpop.f32.mrb[3].mxu0 }
 0x1f8   :  { %v282_v4 = vrot.slane %v281_v0, 4 }
 0x1f9   :  { %v288_v5 = vsel %vm88_vm1, %v280_v2, 0.0 }
 0x1fa   :  { %v283_v6 = vadd.f32 %v282_v4, %v281_v0  ;;  %v289_v7 = vrot.slane %v288_v5, 4  ;;  %v750_v0 = vld [vmem:[%s1196_s9] ss:$0 sm:$0xff] }
 0x1fc   :  { %v284_v8 = vrot.slane %v283_v6, 2  ;;  %v290_v9 = vadd.f32 %v289_v7, %v288_v5  ;;  %v759_v7 = vld [vmem:[%s1200_s13] ss:$0 sm:$0xff] }
 0x1fe   :  { %v285_v10 = vadd.f32 %v284_v8, %v283_v6  ;;  %v291_v11 = vrot.slane %v290_v9, 2 }
 0x200   :  { %v286_v12 = vrot.slane %v285_v10, 1  ;;  %v292_v13 = vadd.f32 %v291_v11, %v290_v9 }
 0x202   :  { %v287_v14 = vadd.f32 %v286_v12, %v285_v10  ;;  %v293_v15 = vrot.slane %v292_v13, 1 }
 0x204   :  { %v295_v16 = vpack.c.bf16 %v287_v14, %v287_v14  ;;  %v294_v17 = vadd.f32 %v293_v15, %v292_v13 }
 0x206   :  { %v296_v18 = vpack.c.bf16 %v294_v17, %v294_v17  ;;  %v310_v19 = vunpack.c.l.b16 %v295_v16  ;;  %v898_v16 = vld [vmem:[%s1202_s15] sm:$0xff]   ;;  %v899_v17 = vld [vmem:[%s1202_s15 + $0x8] sm:$0xff]   ;;  %s942_s15 = smov [#allocation2]  }
 0x207   :  { %s728_s21 = sshll.u32 %s942_s15, 4  ;;  %s729_s21 = int_to_ptr.vmem [resolvable:$true] %s728_s21 }
 0x208   :  { %v311_v20 = vunpack.c.l.b16 %v296_v18  ;;  %s916_s22 = scalar_lea.vmem %s729_s21, 32  ;;  %p921_p1 = scmp.lt.s32.totalorder %s729_s21, %s729_s21 }
 0x209   :  { %p917_p0 = scmp.ne.s32.totalorder %s729_s21, %s916_s22  ;;  %p922_p2 = scmp.lt.s32.totalorder %s916_s22, %s916_s22 }
 0x20a   :  { %v313_v21 = vsel %vm312_vm4, %v311_v20, %v310_v19 }
 0x20b   :  { %v314_v22 = vpack.c.b16 %v313_v21, %v313_v21  ;;  %p923_p3 = por %p922_p2, %p921_p1 }
 0x20d   :  { %829 = vmatmul.mubr.msk.bf16.vlgmr.msra.gmra.mrb[8].mxu1 %vm88_vm1, %v314_v22  ;;  %v768_v22 = vld [vmem:[%s1201_s14] ss:$0 sm:$0xff]  ;;  %p924_p4 = pnand %p923_p3, %p917_p0 }
 0x20e   :  { %844 = vmatprep.mubr.msk.bf16.mxu1 %vm941_vm0, %v940_v1  ;;  %841 = vmatpush3.bf16.msra.mxu1 %v886_v31 }
 0x20f   :  { %842 = vmatprep.subr.bf16.mxu1 %v940_v1 }
 0x212   :  { %843 = vmatpush3.bf16.msra.mxu1 %v888_v33 }
 0x213   :  { %868 = vmatprep.subr.bf16.mxu1 %v940_v1 }
 0x2e0   :  { %v364_v24 = vpop.f32.mrb[8].mxu1 }
 0x2e1   :  { %v365_v25 = vadd.f32 %v745_v23, %v364_v24  ;;  %v830_v26 = vpop.f32.mrb[9].mxu1 }
 0x2e2   :  { %v367_v27 = vpop.f32.mrb[10].mxu1 }
 0x2e3   :  { %v831_v28 = vpop.f32.mrb[11].mxu1  ;;  %v371_v29 = vmul.f32 %v365_v25, %v365_v25 }
 0x2e5   :  { %v373_v30 = vsel %vm372_vm5, %v371_v29, 0.0 }
 0x2e6   :  { %374 = vadd.xlane.f32.xlu0 %v373_v30 }
 0x373   :  { %v375_v35 = vpop.xlane.xlu0 %374 }
 0x374   :  { %908 = vrsqrt.f32 %v375_v35 }
 0x37e   :  { %v909_v36 = vpop.eup %908 }
 0x37f   :  { %v377_v37 = vmul.f32 5.656854, %v909_v36 }
 0x381   :  { %v378_v38 = vmin.f32 %v377_v37, 1e+08 }
 0x383   :  { %v379_v40 = vmul.f32 %v378_v38, %v365_v25 }
 0x385   :  { %v386_v41 = vmul.f32 %v749_v39, %v379_v40 }
 0x387   :  { %v387_v42 = vpack.c.bf16 %v386_v41, %v386_v41 }
 0x389   :  { %837 = vmatmul.mubr.msk.bf16.vlgmr.msra.gmra.mrb[4].mxu0 %vm88_vm1, %v387_v42  ;;  %845 = vmatmul.mubr.msk.bf16.vlgmr.msra.gmra.mrb[12].mxu1 %vm88_vm1, %v387_v42 }
 0x38a   :  { %864 = vmatprep.mubr.msk.bf16.mxu0 %vm941_vm0, %v940_v1  ;;  %872 = vmatprep.mubr.msk.bf16.mxu1 %vm941_vm0, %v940_v1 }
 0x38b   :  { %849 = vmatpush3.bf16.msra.mxu0 %v890_v43  ;;  %869 = vmatpush3.bf16.msra.mxu1 %v898_v16 }
 0x38c   :  { %850 = vmatprep.subr.bf16.mxu0 %v940_v1  ;;  %870 = vmatprep.subr.bf16.mxu1 %v940_v1 }
 0x38f   :  { %851 = vmatpush3.bf16.msra.mxu0 %v891_v44  ;;  %871 = vmatpush3.bf16.msra.mxu1 %v899_v17 }
 0x390   :  { %852 = vmatprep.subr.bf16.mxu0 %v940_v1 }
 0x393   :  { %853 = vmatpush3.bf16.msra.mxu0 %v892_v45 }
 0x394   :  { %854 = vmatprep.subr.bf16.mxu0 %v940_v1 }
 0x397   :  { %855 = vmatpush3.bf16.msra.mxu0 %v893_v46 }
 0x398   :  { %856 = vmatprep.subr.bf16.mxu0 %v940_v1 }
 0x39b   :  { %857 = vmatpush3.bf16.msra.mxu0 %v894_v47 }
 0x39c   :  { %858 = vmatprep.subr.bf16.mxu0 %v940_v1 }
 0x39f   :  { %859 = vmatpush3.bf16.msra.mxu0 %v895_v48 }
 0x3a0   :  { %860 = vmatprep.subr.bf16.mxu0 %v940_v1 }
 0x3a3   :  { %861 = vmatpush3.bf16.msra.mxu0 %v896_v49 }
 0x3a4   :  { %862 = vmatprep.subr.bf16.mxu0 %v940_v1  ;;  %v769_v1 = vld [vmem:[%s1203_s16] ss:$0 sm:$0xff] }
 0x3a7   :  { %863 = vmatpush3.bf16.msra.mxu0 %v897_v50 }
 0x45c   :  { %v448_v52 = vpop.f32.mrb[4].mxu0  ;;  %v511_v53 = vpop.f32.mrb[12].mxu1 }
 0x45d   :  { %v512_v54 = vadd.f32 %v754_v51, %v511_v53  ;;  %v838_v55 = vpop.f32.mrb[5].mxu0  ;;  %v846_v56 = vpop.f32.mrb[13].mxu1  ;;  %v449_v3 = vadd.f32 %v750_v0, %v448_v52 }
 0x45e   :  { %v451_v57 = vpop.f32.mrb[6].mxu0  ;;  %v514_v58 = vpop.f32.mrb[14].mxu1 }
 0x45f   :  { %v758_v59 = vmul.f32 -1.442695, %v512_v54  ;;  %v839_v60 = vpop.f32.mrb[7].mxu0  ;;  %v847_v61 = vpop.f32.mrb[15].mxu1 }
 0x461   :  { %910 = vpow2.f32 %v758_v59 }
 0x46b   :  { %v911_v62 = vpop.eup %910 }
 0x46c   :  { %v520_v63 = vadd.f32 1.0, %v911_v62 }
 0x46e   :  { %912 = vrcp.f32 %v520_v63 }
 0x478   :  { %v913_v2 = vpop.eup %912 }
 0x479   :  { %v523_v4 = vmul.f32 %v913_v2, %v512_v54 }
 0x47b   :  { %v524_v5 = vmul.f32 %v523_v4, %v449_v3 }
 0x47d   :  { %v525_v6 = vpack.c.bf16 %v524_v5, %v524_v5 }
 0x47f   :  { %865 = vmatmul.mubr.bf16.vlgmr.msra.gmra.mrb[8].mxu0 %v525_v6 }
 0x552   :  { %v631_v8 = vpop.f32.mrb[8].mxu0 }
 0x553   :  { %v632_v9 = vadd.f32 %v759_v7, %v631_v8  ;;  %v866_v10 = vpop.f32.mrb[9].mxu0 }
 0x554   :  { %v634_v11 = vpop.f32.mrb[10].mxu0 }
 0x555   :  { %v637_v12 = vadd.f32 %v632_v9, %v386_v41  ;;  %v867_v13 = vpop.f32.mrb[11].mxu0 }
 0x557   :  { %v639_v14 = vmul.f32 %v637_v12, %v637_v12 }
 0x559   :  { %v640_v15 = vsel %vm372_vm5, %v639_v14, 0.0 }
 0x55a   :  { %641 = vadd.xlane.f32.xlu0 %v640_v15 }
 0x5e7   :  { %v642_v18 = vpop.xlane.xlu0 %641 }
 0x5e8   :  { %914 = vrsqrt.f32 %v642_v18 }
 0x5f2   :  { %v915_v19 = vpop.eup %914 }
 0x5f3   :  { %v644_v20 = vmul.f32 5.656854, %v915_v19 }
 0x5f5   :  { %v645_v21 = vmin.f32 %v644_v20, 1e+08 }
 0x5f7   :  { %v646_v23 = vmul.f32 %v645_v21, %v637_v12 }
 0x5f9   :  { %v653_v24 = vmul.f32 %v768_v22, %v646_v23 }
 0x5fb   :  { %v654_v25 = vpack.c.bf16 %v653_v24, %v653_v24 }
 0x5fd   :  { %873 = vmatmul.mubr.msk.bf16.vlgmr.msra.gmra.mrb[16].mxu1 %vm88_vm1, %v654_v25 }
 0x6d0   :  { %v715_v26 = vpop.f32.mrb[16].mxu1 }
 0x6d1   :  { %v716_v27 = vadd.f32 %v769_v1, %v715_v26  ;;  %v874_v28 = vpop.f32.mrb[17].mxu1 }
 0x6d2   :  { %v718_v29 = vpop.f32.mrb[18].mxu1 }
 0x6d3   :  { %721 = vst [vmem:[#allocation2] sm:$0x3] %v716_v27  ;;  %v875_v30 = vpop.f32.mrb[19].mxu1 }
 0x6d4   :  { %927 = shalt.err (!%p924_p4)
}
 0x6d5   :  { %s928_s16 = scalar_lea.hbm %s1204_s17, 32 }
 0x6d6   :  { %p929_p5 = scmp.ne.s32.totalorder %s1204_s17, %s928_s16  ;;  %p932_p6 = scmp.lt.u32.totalorder %s928_s16, %s1204_s17 }
 0x6d8   :  { %p934_p7 = pnand %p932_p6, %p929_p5 }
 0x6da   :  { %937 = shalt.err (!%p934_p7)
}
 0x6db   :  { %731 = dma.vmem_to_hbm [thread:$0]  %s729_s21, 32, %s1204_s17, [#allocation3]  }
 0x6dc   :  { %938 = dma.done.wait [#allocation3], 32  }
 0x6dd   :  { %939 = vsyncadd [#allocation3], 4294967264 }
 0x6de   :  { %735 = vsyncpa [#allocation3], 1 }

</bundles_post_ra>
